<compile_context>
chip_gen: v7x
topology: tpu7x:2x2x1
jax: 0.10.0
libtpu: 0.0.40
codegen_flags: <defaults>
</compile_context>

<pallas_src>
import functools
import math

import jax
import jax.numpy as jnp
from jax.experimental import pallas as pl
from jax.experimental.pallas import tpu as pltpu

F32 = jnp.float32


# --------------------------------------------------------------------------
# fused MixMlp kernel: one grid step == one (batch element, spatial row band)
# --------------------------------------------------------------------------
def _mixmlp_kernel(x_ref, w1_ref, b1_ref, wdw_ref, bdw_ref, w2_ref, b2_ref,
                   o_ref, hp_ref, *, sz, band_rows, c_left, mxu_dtype,
                   compute_dtype):
    """Fused fc1 -> depthwise 3x3 -> GELU -> fc2 for one row band.

    x_ref   : (1, N, Cin)            full per-batch tokens (resident across bands)
    w1_ref  : (Cin, Hd) mxu_dtype    fc1 weight      b1_ref : (1, Hd) f32
    wdw_ref : (9, Hd) compute_dtype  dw 3x3 weight   bdw_ref: (1, Hd) compute_dtype
    w2_ref  : (Hd, Cout) mxu_dtype   fc2 weight      b2_ref : (1, Cout) f32
    o_ref   : (1, band_rows*sz, Cout)
    hp_ref  : VMEM (band_rows+2, c_left+sz+1, Hd) compute_dtype
              column-padded hidden band; interior columns start at c_left
              (sublane-tile aligned so the big interior store is unmasked).
    """
    Cin = x_ref.shape[2]
    Hd = w1_ref.shape[1]
    band_toks = band_rows * sz
    rows_p = band_rows + 2
    n_total = sz * sz

    j = pl.program_id(1)
    n_bands = pl.num_programs(1)
    tok0 = j * band_toks
    if band_toks % 8 == 0:
        tok0 = pl.multiple_of(tok0, 8)

    w1 = w1_ref[...]                      # already mxu_dtype (pre-cast in wrapper)
    b1 = b1_ref[...]                      # (1, Hd) f32

    def fc1_rows(tok_start, n_tok):
        """fc1 (+bias) for n_tok consecutive tokens; f32 result."""
        xs = x_ref[pl.ds(0, 1), pl.ds(tok_start, n_tok), :].reshape(n_tok, Cin)
        return jnp.dot(xs.astype(mxu_dtype), w1,
                       preferred_element_type=F32) + b1

    # ---- fc1 of the band interior -> padded scratch (aligned column offset) --
    hp_ref[pl.ds(1, band_rows), pl.ds(c_left, sz), :] = (
        fc1_rows(tok0, band_toks).astype(compute_dtype)
        .reshape(band_rows, sz, Hd))

    # ---- halo border: zero ONLY the two 1-column strips (left/right pad) -----
    # (Every step: the scratch persists across steps and megacore sharding
    #  means program_id == 0 is not the first step on every core.)
    zero_col = jnp.zeros((rows_p, 1, Hd), compute_dtype)
    hp_ref[pl.ds(0, rows_p), pl.ds(c_left - 1, 1), :] = zero_col
    hp_ref[pl.ds(0, rows_p), pl.ds(c_left + sz, 1), :] = zero_col

    # ---- top / bottom halo rows: recompute fc1 of the neighbor row, masked ---
    # to zero at the image border (branch-free; the 2 small matmuls are cheap).
    top_mask = jnp.where(j > 0, 1.0, 0.0).astype(F32)
    top = fc1_rows(jnp.maximum(tok0 - sz, 0), sz) * top_mask
    hp_ref[pl.ds(0, 1), pl.ds(c_left, sz), :] = (
        top.astype(compute_dtype).reshape(1, sz, Hd))

    bot_mask = jnp.where(j < n_bands - 1, 1.0, 0.0).astype(F32)
    bot = fc1_rows(jnp.minimum(tok0 + band_toks, n_total - sz), sz) * bot_mask
    hp_ref[pl.ds(band_rows + 1, 1), pl.ds(c_left, sz), :] = (
        bot.astype(compute_dtype).reshape(1, sz, Hd))

    # ---- depthwise 3x3: 3 column-shifted slab loads (one sublane shift per --
    # kx), reused across the 3 ky offsets (leading-dim row slices are ~free).
    # The dwconv bias is folded into the first tap (no zero-init accumulator).
    wdw = wdw_ref[...]                    # (9, Hd) compute_dtype
    bdw = bdw_ref[...]                    # (1, Hd) compute_dtype
    acc = None
    for kx in range(3):
        slab = hp_ref[pl.ds(0, rows_p), pl.ds(c_left - 1 + kx, sz), :]
        for ky in range(3):
            k = ky * 3 + kx
            term = slab[ky:ky + band_rows] * wdw[k:k + 1, :]
            acc = (term + bdw) if acc is None else (acc + term)

    # ---- GELU ----------------------------------------------------------------
    # TODO(synk): torch nn.GELU defaults to exact erf; the tanh approximation
    # is used here for robust Mosaic lowering (small systematic drift).
    g = jax.nn.gelu(acc, approximate=True)

    # ---- fc2: MXU matmul, bf16 operands, f32 accumulation ---------------------
    out = jnp.dot(g.reshape(band_toks, Hd).astype(mxu_dtype), w2_ref[...],
                  preferred_element_type=F32)
    o_ref[0] = (out + b2_ref[...]).astype(o_ref.dtype)


# --------------------------------------------------------------------------
# helpers
# --------------------------------------------------------------------------
def _default_elementwise_dtype():
    """bf16 elementwise math on v6e/v7x (bf16 VALU/EUP); f32 on v5e."""
    try:
        kind = jax.devices()[0].device_kind.lower()
    except Exception:
        kind = ""
    if "v5 lite" in kind or "v5lite" in kind or "v5e" in kind:
        return jnp.float32
    return jnp.bfloat16


def _nbytes(shape, dtype):
    return math.prod(shape) * jnp.dtype(dtype).itemsize


def _pick_band_rows(sz):
    """Largest divisor of sz giving <= 1024 tokens per band."""
    best = 1
    for d in range(1, sz + 1):
        if sz % d == 0 and d * sz <= 1024:
            best = d
    return best


# --------------------------------------------------------------------------
# wrapper
# --------------------------------------------------------------------------
def mixmlp_forward(x, params, *, band_rows=None, mxu_dtype=jnp.bfloat16,
                   compute_dtype=None):
    """MixMlp.forward.  x: (B, N, Cin) tokens, N must be a perfect square."""
    B, N, Cin = x.shape
    sz = int(round(math.sqrt(N)))
    assert sz * sz == N, "MixMlp requires a square token grid"
    Hd = params["fc1_w"].shape[1]
    Cout = params["fc2_w"].shape[1]

    if compute_dtype is None:
        compute_dtype = _default_elementwise_dtype()
    if band_rows is None:
        band_rows = _pick_band_rows(sz)
    assert sz % band_rows == 0, "band_rows must divide sz"
    if band_rows != sz and (band_rows * sz) % 8 != 0:
        band_rows = sz                       # keep output blocks (8,128)-legal
    n_bands = sz // band_rows
    band_toks = band_rows * sz

    # interior column offset: sublane-tile aligned for the compute dtype
    c_left = 8 if jnp.dtype(compute_dtype).itemsize >= 4 else 16
    cols_p = c_left + sz + 1

    # Pre-cast params once in the wrapper (no per-step casts, no duplicate
    # f32 copies of the weights resident in VMEM).
    w1 = params["fc1_w"].astype(mxu_dtype)
    w2 = params["fc2_w"].astype(mxu_dtype)
    b1 = params["fc1_b"].reshape(1, Hd).astype(F32)
    b2 = params["fc2_b"].reshape(1, Cout).astype(F32)
    wdw = params["dw_w"].reshape(9, Hd).astype(compute_dtype)
    bdw = params["dw_b"].reshape(1, Hd).astype(compute_dtype)

    # VMEM budget from the real per-step working set: double-buffered I/O
    # blocks + resident (double-buffered) weights + padded band scratch +
    # elementwise temporaries (3 slabs, acc, gelu, f32 matmul results).
    est = (2 * _nbytes((1, N, Cin), x.dtype)
           + 2 * _nbytes((1, band_toks, Cout), x.dtype)
           + 2 * (_nbytes((Cin, Hd), mxu_dtype) + _nbytes((Hd, Cout), mxu_dtype)
                  + _nbytes((1, Hd), F32) + _nbytes((1, Cout), F32)
                  + _nbytes((9, Hd), compute_dtype) + _nbytes((1, Hd), compute_dtype))
           + _nbytes((band_rows + 2, cols_p, Hd), compute_dtype)
           + 6 * _nbytes((band_toks, Hd), compute_dtype)
           + 2 * _nbytes((band_toks, Hd), F32))
    vmem_limit = int(min(max(2 * est, 32 * (1 << 20)), 100 * (1 << 20)))

    kernel = functools.partial(
        _mixmlp_kernel, sz=sz, band_rows=band_rows, c_left=c_left,
        mxu_dtype=mxu_dtype, compute_dtype=compute_dtype)

    grid_spec = pltpu.PrefetchScalarGridSpec(
        num_scalar_prefetch=0,
        grid=(B, n_bands),
        in_specs=[
            # x: full per-batch block; constant block index across the band
            # axis, so Pallas does not re-DMA it between band steps.
            pl.BlockSpec((1, N, Cin), lambda b, j: (b, 0, 0)),
            pl.BlockSpec((Cin, Hd), lambda b, j: (0, 0)),     # fc1 w (resident)
            pl.BlockSpec((1, Hd), lambda b, j: (0, 0)),       # fc1 b
            pl.BlockSpec((9, Hd), lambda b, j: (0, 0)),       # dw w
            pl.BlockSpec((1, Hd), lambda b, j: (0, 0)),       # dw b
            pl.BlockSpec((Hd, Cout), lambda b, j: (0, 0)),    # fc2 w (resident)
            pl.BlockSpec((1, Cout), lambda b, j: (0, 0)),     # fc2 b
        ],
        out_specs=pl.BlockSpec((1, band_toks, Cout), lambda b, j: (b, j, 0)),
        scratch_shapes=[
            pltpu.VMEM((band_rows + 2, cols_p, Hd), compute_dtype)],
    )

    return pl.pallas_call(
        kernel,
        out_shape=jax.ShapeDtypeStruct((B, N, Cout), x.dtype),
        grid_spec=grid_spec,
        compiler_params=pltpu.CompilerParams(
            dimension_semantics=("parallel", "arbitrary"),
            vmem_limit_bytes=vmem_limit,
        ),
    )(x, w1, b1, wdw, bdw, w2, b2)


# --------------------------------------------------------------------------
# pure-JAX reference (mirrors the PyTorch forward and the kernel's dtype /
# accumulation-order choices, so the self-test isolates kernel bugs).
# Note: like the kernel, it uses tanh-GELU and bf16 MXU operands, which drift
# slightly from a pure-fp32 erf-GELU PyTorch forward.
# --------------------------------------------------------------------------
def mixmlp_reference(x, params, *, mxu_dtype=jnp.bfloat16,
                     compute_dtype=jnp.bfloat16):
    B, N, Cin = x.shape
    sz = int(round(math.sqrt(N)))
    Hd = params["fc1_w"].shape[1]
    Cout = params["fc2_w"].shape[1]

    h = jnp.dot(x.astype(mxu_dtype), params["fc1_w"].astype(mxu_dtype),
                preferred_element_type=F32) + params["fc1_b"].astype(F32)
    hs = h.astype(compute_dtype).reshape(B, sz, sz, Hd)   # token n = row*sz + col
    hp = jnp.pad(hs, ((0, 0), (1, 1), (1, 1), (0, 0)))
    wdw = params["dw_w"].reshape(9, Hd).astype(compute_dtype)
    bdw = params["dw_b"].reshape(1, Hd).astype(compute_dtype)
    acc = None
    for kx in range(3):                       # same order / bias fold as kernel
        for ky in range(3):
            k = ky * 3 + kx
            term = hp[:, ky:ky + sz, kx:kx + sz, :] * wdw[k:k + 1, :]
            acc = (term + bdw) if acc is None else (acc + term)
    g = jax.nn.gelu(acc, approximate=True)
    out = jnp.dot(g.reshape(B * N, Hd).astype(mxu_dtype),
                  params["fc2_w"].astype(mxu_dtype),
                  preferred_element_type=F32) + params["fc2_b"].astype(F32)
    # dropout (p=0.0 / eval) is the identity
    return out.reshape(B, N, Cout).astype(x.dtype)


# --------------------------------------------------------------------------
# deterministic parameter construction
# --------------------------------------------------------------------------
def init_params(key, in_features, hidden_features, out_features):
    k1, k2, k3, k4, k5, k6 = jax.random.split(key, 6)

    def normal(k, shape, std=0.02):
        return std * jax.random.normal(k, shape, dtype=F32)

    return {
        "fc1_w": normal(k1, (in_features, hidden_features)),
        "fc1_b": normal(k2, (hidden_features,)),
        "dw_w": normal(k3, (3, 3, hidden_features)),     # [ky, kx, channel]
        "dw_b": normal(k4, (hidden_features,)),
        "fc2_w": normal(k5, (hidden_features, out_features)),
        "fc2_b": normal(k6, (out_features,)),
    }


if __name__ == "__main__":
    # Small but lane-aligned demo shapes: B=2, 16x16 token grid (N=256),
    # in/out features 128, hidden 256; 4 spatial row bands per batch element
    # so the banded/halo path is actually exercised (grid = (2, 4)).
    B, sz, C, Hd = 2, 16, 128, 256
    N = sz * sz

    key = jax.random.PRNGKey(0)
    pkey, xkey = jax.random.split(key)
    params = init_params(pkey, C, Hd, C)
    x = jax.random.normal(xkey, (B, N, C), dtype=jnp.float32)

    cdtype = _default_elementwise_dtype()
    fwd = jax.jit(functools.partial(mixmlp_forward, band_rows=4,
                                    compute_dtype=cdtype))
    out = jax.block_until_ready(fwd(x, params))

    assert out.shape == (B, N, C), out.shape
    assert bool(jnp.all(jnp.isfinite(out)))

    ref = mixmlp_reference(x, params, compute_dtype=cdtype)
    max_err = float(jnp.max(jnp.abs(out - ref)))
    assert max_err < 2e-3, f"mismatch vs reference: {max_err}"

    print("KERNEL_OK")
</pallas_src>

<mosaic_0001>
module attributes {stable_mosaic.version = 11 : i64} {
  func.func @_mixmlp_kernel(%arg0: i32, %arg1: i32, %arg2: memref<1x256x128xf32, #tpu.memory_space<vmem>>, %arg3: memref<128x256xbf16, #tpu.memory_space<vmem>>, %arg4: memref<1x256xf32, #tpu.memory_space<vmem>>, %arg5: memref<9x256xbf16, #tpu.memory_space<vmem>>, %arg6: memref<1x256xbf16, #tpu.memory_space<vmem>>, %arg7: memref<256x128xbf16, #tpu.memory_space<vmem>>, %arg8: memref<1x128xf32, #tpu.memory_space<vmem>>, %arg9: memref<1x64x128xf32, #tpu.memory_space<vmem>>, %arg10: memref<6x33x256xbf16, #tpu.memory_space<vmem>>) attributes {dimension_semantics = [#tpu.dimension_semantics<parallel>, #tpu.dimension_semantics<arbitrary>], iteration_bounds = array<i64: 2, 4>, scalar_prefetch = 0 : i64, scratch_operands = 1 : i64, tpu.core_type = #tpu.core_type<tc>, window_params = [{transform_indices = @transform_0, window_bounds = array<i64: 1, 256, 128>}, {pipeline_mode = #tpu.pipeline_mode<synchronous>, transform_indices = @transform_1, window_bounds = array<i64: 128, 256>}, {pipeline_mode = #tpu.pipeline_mode<synchronous>, transform_indices = @transform_2, window_bounds = array<i64: 1, 256>}, {pipeline_mode = #tpu.pipeline_mode<synchronous>, transform_indices = @transform_3, window_bounds = array<i64: 9, 256>}, {pipeline_mode = #tpu.pipeline_mode<synchronous>, transform_indices = @transform_4, window_bounds = array<i64: 1, 256>}, {pipeline_mode = #tpu.pipeline_mode<synchronous>, transform_indices = @transform_5, window_bounds = array<i64: 256, 128>}, {pipeline_mode = #tpu.pipeline_mode<synchronous>, transform_indices = @transform_6, window_bounds = array<i64: 1, 128>}, {transform_indices = @transform_7, window_bounds = array<i64: 1, 64, 128>}]} {
    %c64_i32 = arith.constant 64 : i32
    %0 = arith.muli %arg1, %c64_i32 : i32
    %1 = tpu.assume_multiple %0, 8 : i32
    %c0 = arith.constant 0 : index
    %c0_0 = arith.constant 0 : index
    %2 = vector.load %arg3[%c0, %c0_0] : memref<128x256xbf16, #tpu.memory_space<vmem>>, vector<128x256xbf16>
    %c0_1 = arith.constant 0 : index
    %c0_2 = arith.constant 0 : index
    %3 = vector.load %arg4[%c0_1, %c0_2] : memref<1x256xf32, #tpu.memory_space<vmem>>, vector<1x256xf32>
    %c0_3 = arith.constant 0 : index
    %4 = arith.index_cast %1 : i32 to index
    %c0_4 = arith.constant 0 : index
    %5 = vector.load %arg2[%c0_3, %4, %c0_4] : memref<1x256x128xf32, #tpu.memory_space<vmem>>, vector<1x64x128xf32>
    %6 = vector.shape_cast %5 : vector<1x64x128xf32> to vector<64x128xf32>
    %7 = arith.truncf %6 : vector<64x128xf32> to vector<64x128xbf16>
    %cst = arith.constant dense<0.000000e+00> : vector<64x256xf32>
    %8 = tpu.matmul %7, %2, %cst {dimension_numbers = #tpu.dot_dimension_numbers<[1], [0], [0], [1], [0, 0, 1, 1], [], []>} : vector<64x128xbf16>, vector<128x256xbf16>, vector<64x256xf32> -> vector<64x256xf32>
    %9 = vector.broadcast %3 : vector<1x256xf32> to vector<64x256xf32>
    %10 = arith.addf %8, %9 : vector<64x256xf32>
    %11 = arith.truncf %10 : vector<64x256xf32> to vector<64x256xbf16>
    %12 = vector.shape_cast %11 : vector<64x256xbf16> to vector<4x16x256xbf16>
    %c1 = arith.constant 1 : index
    %c16 = arith.constant 16 : index
    %c0_5 = arith.constant 0 : index
    %13 = vector.load %arg10[%c1, %c16, %c0_5] : memref<6x33x256xbf16, #tpu.memory_space<vmem>>, vector<4x16x256xbf16>
    tpu.vector_store %arg10[%c1, %c16, %c0_5], %12 {strides = array<i32>} : memref<6x33x256xbf16, #tpu.memory_space<vmem>>, vector<4x16x256xbf16>,
    %cst_6 = arith.constant 0.000000e+00 : bf16
    %14 = vector.broadcast %cst_6 : bf16 to vector<6x1x256xbf16>
    %c0_7 = arith.constant 0 : index
    %c15 = arith.constant 15 : index
    %c0_8 = arith.constant 0 : index
    %15 = vector.load %arg10[%c0_7, %c15, %c0_8] : memref<6x33x256xbf16, #tpu.memory_space<vmem>>, vector<6x1x256xbf16>
    tpu.vector_store %arg10[%c0_7, %c15, %c0_8], %14 {strides = array<i32>} : memref<6x33x256xbf16, #tpu.memory_space<vmem>>, vector<6x1x256xbf16>,
    %c0_9 = arith.constant 0 : index
    %c32 = arith.constant 32 : index
    %c0_10 = arith.constant 0 : index
    %16 = vector.load %arg10[%c0_9, %c32, %c0_10] : memref<6x33x256xbf16, #tpu.memory_space<vmem>>, vector<6x1x256xbf16>
    tpu.vector_store %arg10[%c0_9, %c32, %c0_10], %14 {strides = array<i32>} : memref<6x33x256xbf16, #tpu.memory_space<vmem>>, vector<6x1x256xbf16>,
    %c0_i32 = arith.constant 0 : i32
    %17 = arith.cmpi sgt, %arg1, %c0_i32 : i32
    %cst_11 = arith.constant 1.000000e+00 : f32
    %cst_12 = arith.constant 0.000000e+00 : f32
    %18 = arith.select %17, %cst_11, %cst_12 : f32
    %c16_i32 = arith.constant 16 : i32
    %19 = arith.subi %1, %c16_i32 : i32
    %c0_i32_13 = arith.constant 0 : i32
    %20 = arith.maxsi %19, %c0_i32_13 : i32
    %c0_14 = arith.constant 0 : index
    %21 = arith.index_cast %20 : i32 to index
    %c0_15 = arith.constant 0 : index
    %22 = vector.load %arg2[%c0_14, %21, %c0_15] : memref<1x256x128xf32, #tpu.memory_space<vmem>>, vector<1x16x128xf32>
    %23 = vector.shape_cast %22 : vector<1x16x128xf32> to vector<16x128xf32>
    %24 = arith.truncf %23 : vector<16x128xf32> to vector<16x128xbf16>
    %cst_16 = arith.constant dense<0.000000e+00> : vector<16x256xf32>
    %25 = tpu.matmul %24, %2, %cst_16 {dimension_numbers = #tpu.dot_dimension_numbers<[1], [0], [0], [1], [0, 0, 1, 1], [], []>} : vector<16x128xbf16>, vector<128x256xbf16>, vector<16x256xf32> -> vector<16x256xf32>
    %26 = vector.broadcast %3 : vector<1x256xf32> to vector<16x256xf32>
    %27 = arith.addf %25, %26 : vector<16x256xf32>
    %28 = vector.broadcast %18 : f32 to vector<16x256xf32>
    %29 = arith.mulf %27, %28 : vector<16x256xf32>
    %30 = arith.truncf %29 : vector<16x256xf32> to vector<16x256xbf16>
    %31 = vector.shape_cast %30 : vector<16x256xbf16> to vector<1x16x256xbf16>
    %c0_17 = arith.constant 0 : index
    %c16_18 = arith.constant 16 : index
    %c0_19 = arith.constant 0 : index
    %32 = vector.load %arg10[%c0_17, %c16_18, %c0_19] : memref<6x33x256xbf16, #tpu.memory_space<vmem>>, vector<1x16x256xbf16>
    tpu.vector_store %arg10[%c0_17, %c16_18, %c0_19], %31 {strides = array<i32>} : memref<6x33x256xbf16, #tpu.memory_space<vmem>>, vector<1x16x256xbf16>,
    %c3_i32 = arith.constant 3 : i32
    %33 = arith.cmpi slt, %arg1, %c3_i32 : i32
    %cst_20 = arith.constant 1.000000e+00 : f32
    %cst_21 = arith.constant 0.000000e+00 : f32
    %34 = arith.select %33, %cst_20, %cst_21 : f32
    %c64_i32_22 = arith.constant 64 : i32
    %35 = arith.addi %1, %c64_i32_22 : i32
    %c240_i32 = arith.constant 240 : i32
    %36 = arith.minsi %35, %c240_i32 : i32
    %c0_23 = arith.constant 0 : index
    %37 = arith.index_cast %36 : i32 to index
    %c0_24 = arith.constant 0 : index
    %38 = vector.load %arg2[%c0_23, %37, %c0_24] : memref<1x256x128xf32, #tpu.memory_space<vmem>>, vector<1x16x128xf32>
    %39 = vector.shape_cast %38 : vector<1x16x128xf32> to vector<16x128xf32>
    %40 = arith.truncf %39 : vector<16x128xf32> to vector<16x128xbf16>
    %cst_25 = arith.constant dense<0.000000e+00> : vector<16x256xf32>
    %41 = tpu.matmul %40, %2, %cst_25 {dimension_numbers = #tpu.dot_dimension_numbers<[1], [0], [0], [1], [0, 0, 1, 1], [], []>} : vector<16x128xbf16>, vector<128x256xbf16>, vector<16x256xf32> -> vector<16x256xf32>
    %42 = vector.broadcast %3 : vector<1x256xf32> to vector<16x256xf32>
    %43 = arith.addf %41, %42 : vector<16x256xf32>
    %44 = vector.broadcast %34 : f32 to vector<16x256xf32>
    %45 = arith.mulf %43, %44 : vector<16x256xf32>
    %46 = arith.truncf %45 : vector<16x256xf32> to vector<16x256xbf16>
    %47 = vector.shape_cast %46 : vector<16x256xbf16> to vector<1x16x256xbf16>
    %c5 = arith.constant 5 : index
    %c16_26 = arith.constant 16 : index
    %c0_27 = arith.constant 0 : index
    %48 = vector.load %arg10[%c5, %c16_26, %c0_27] : memref<6x33x256xbf16, #tpu.memory_space<vmem>>, vector<1x16x256xbf16>
    tpu.vector_store %arg10[%c5, %c16_26, %c0_27], %47 {strides = array<i32>} : memref<6x33x256xbf16, #tpu.memory_space<vmem>>, vector<1x16x256xbf16>,
    %c0_28 = arith.constant 0 : index
    %c0_29 = arith.constant 0 : index
    %49 = vector.load %arg5[%c0_28, %c0_29] : memref<9x256xbf16, #tpu.memory_space<vmem>>, vector<9x256xbf16>
    %c0_30 = arith.constant 0 : index
    %c0_31 = arith.constant 0 : index
    %50 = vector.load %arg6[%c0_30, %c0_31] : memref<1x256xbf16, #tpu.memory_space<vmem>>, vector<1x256xbf16>
    %c0_32 = arith.constant 0 : index
    %c15_33 = arith.constant 15 : index
    %c0_34 = arith.constant 0 : index
    %51 = vector.load %arg10[%c0_32, %c15_33, %c0_34] : memref<6x33x256xbf16, #tpu.memory_space<vmem>>, vector<6x16x256xbf16>
    %52 = vector.extract_strided_slice %51 {offsets = [0, 0, 0], sizes = [4, 16, 256], strides = [1, 1, 1]} : vector<6x16x256xbf16> to vector<4x16x256xbf16>
    %53 = vector.extract_strided_slice %49 {offsets = [0, 0], sizes = [1, 256], strides = [1, 1]} : vector<9x256xbf16> to vector<1x256xbf16>
    %54 = vector.shape_cast %53 : vector<1x256xbf16> to vector<1x1x256xbf16>
    %55 = vector.broadcast %54 : vector<1x1x256xbf16> to vector<4x16x256xbf16>
    %56 = arith.mulf %52, %55 : vector<4x16x256xbf16>
    %57 = vector.shape_cast %50 : vector<1x256xbf16> to vector<1x1x256xbf16>
    %58 = vector.broadcast %57 : vector<1x1x256xbf16> to vector<4x16x256xbf16>
    %59 = arith.addf %56, %58 : vector<4x16x256xbf16>
    %60 = vector.extract_strided_slice %51 {offsets = [1, 0, 0], sizes = [4, 16, 256], strides = [1, 1, 1]} : vector<6x16x256xbf16> to vector<4x16x256xbf16>
    %61 = vector.extract_strided_slice %49 {offsets = [3, 0], sizes = [1, 256], strides = [1, 1]} : vector<9x256xbf16> to vector<1x256xbf16>
    %62 = vector.shape_cast %61 : vector<1x256xbf16> to vector<1x1x256xbf16>
    %63 = vector.broadcast %62 : vector<1x1x256xbf16> to vector<4x16x256xbf16>
    %64 = arith.mulf %60, %63 : vector<4x16x256xbf16>
    %65 = arith.addf %59, %64 : vector<4x16x256xbf16>
    %66 = vector.extract_strided_slice %51 {offsets = [2, 0, 0], sizes = [4, 16, 256], strides = [1, 1, 1]} : vector<6x16x256xbf16> to vector<4x16x256xbf16>
    %67 = vector.extract_strided_slice %49 {offsets = [6, 0], sizes = [1, 256], strides = [1, 1]} : vector<9x256xbf16> to vector<1x256xbf16>
    %68 = vector.shape_cast %67 : vector<1x256xbf16> to vector<1x1x256xbf16>
    %69 = vector.broadcast %68 : vector<1x1x256xbf16> to vector<4x16x256xbf16>
    %70 = arith.mulf %66, %69 : vector<4x16x256xbf16>
    %71 = arith.addf %65, %70 : vector<4x16x256xbf16>
    %c0_35 = arith.constant 0 : index
    %c16_36 = arith.constant 16 : index
    %c0_37 = arith.constant 0 : index
    %72 = vector.load %arg10[%c0_35, %c16_36, %c0_37] : memref<6x33x256xbf16, #tpu.memory_space<vmem>>, vector<6x16x256xbf16>
    %73 = vector.extract_strided_slice %72 {offsets = [0, 0, 0], sizes = [4, 16, 256], strides = [1, 1, 1]} : vector<6x16x256xbf16> to vector<4x16x256xbf16>
    %74 = vector.extract_strided_slice %49 {offsets = [1, 0], sizes = [1, 256], strides = [1, 1]} : vector<9x256xbf16> to vector<1x256xbf16>
    %75 = vector.shape_cast %74 : vector<1x256xbf16> to vector<1x1x256xbf16>
    %76 = vector.broadcast %75 : vector<1x1x256xbf16> to vector<4x16x256xbf16>
    %77 = arith.mulf %73, %76 : vector<4x16x256xbf16>
    %78 = arith.addf %71, %77 : vector<4x16x256xbf16>
    %79 = vector.extract_strided_slice %72 {offsets = [1, 0, 0], sizes = [4, 16, 256], strides = [1, 1, 1]} : vector<6x16x256xbf16> to vector<4x16x256xbf16>
    %80 = vector.extract_strided_slice %49 {offsets = [4, 0], sizes = [1, 256], strides = [1, 1]} : vector<9x256xbf16> to vector<1x256xbf16>
    %81 = vector.shape_cast %80 : vector<1x256xbf16> to vector<1x1x256xbf16>
    %82 = vector.broadcast %81 : vector<1x1x256xbf16> to vector<4x16x256xbf16>
    %83 = arith.mulf %79, %82 : vector<4x16x256xbf16>
    %84 = arith.addf %78, %83 : vector<4x16x256xbf16>
    %85 = vector.extract_strided_slice %72 {offsets = [2, 0, 0], sizes = [4, 16, 256], strides = [1, 1, 1]} : vector<6x16x256xbf16> to vector<4x16x256xbf16>
    %86 = vector.extract_strided_slice %49 {offsets = [7, 0], sizes = [1, 256], strides = [1, 1]} : vector<9x256xbf16> to vector<1x256xbf16>
    %87 = vector.shape_cast %86 : vector<1x256xbf16> to vector<1x1x256xbf16>
    %88 = vector.broadcast %87 : vector<1x1x256xbf16> to vector<4x16x256xbf16>
    %89 = arith.mulf %85, %88 : vector<4x16x256xbf16>
    %90 = arith.addf %84, %89 : vector<4x16x256xbf16>
    %c0_38 = arith.constant 0 : index
    %c17 = arith.constant 17 : index
    %c0_39 = arith.constant 0 : index
    %91 = vector.load %arg10[%c0_38, %c17, %c0_39] : memref<6x33x256xbf16, #tpu.memory_space<vmem>>, vector<6x16x256xbf16>
    %92 = vector.extract_strided_slice %91 {offsets = [0, 0, 0], sizes = [4, 16, 256], strides = [1, 1, 1]} : vector<6x16x256xbf16> to vector<4x16x256xbf16>
    %93 = vector.extract_strided_slice %49 {offsets = [2, 0], sizes = [1, 256], strides = [1, 1]} : vector<9x256xbf16> to vector<1x256xbf16>
    %94 = vector.shape_cast %93 : vector<1x256xbf16> to vector<1x1x256xbf16>
    %95 = vector.broadcast %94 : vector<1x1x256xbf16> to vector<4x16x256xbf16>
    %96 = arith.mulf %92, %95 : vector<4x16x256xbf16>
    %97 = arith.addf %90, %96 : vector<4x16x256xbf16>
    %98 = vector.extract_strided_slice %91 {offsets = [1, 0, 0], sizes = [4, 16, 256], strides = [1, 1, 1]} : vector<6x16x256xbf16> to vector<4x16x256xbf16>
    %99 = vector.extract_strided_slice %49 {offsets = [5, 0], sizes = [1, 256], strides = [1, 1]} : vector<9x256xbf16> to vector<1x256xbf16>
    %100 = vector.shape_cast %99 : vector<1x256xbf16> to vector<1x1x256xbf16>
    %101 = vector.broadcast %100 : vector<1x1x256xbf16> to vector<4x16x256xbf16>
    %102 = arith.mulf %98, %101 : vector<4x16x256xbf16>
    %103 = arith.addf %97, %102 : vector<4x16x256xbf16>
    %104 = vector.extract_strided_slice %91 {offsets = [2, 0, 0], sizes = [4, 16, 256], strides = [1, 1, 1]} : vector<6x16x256xbf16> to vector<4x16x256xbf16>
    %105 = vector.extract_strided_slice %49 {offsets = [8, 0], sizes = [1, 256], strides = [1, 1]} : vector<9x256xbf16> to vector<1x256xbf16>
    %106 = vector.shape_cast %105 : vector<1x256xbf16> to vector<1x1x256xbf16>
    %107 = vector.broadcast %106 : vector<1x1x256xbf16> to vector<4x16x256xbf16>
    %108 = arith.mulf %104, %107 : vector<4x16x256xbf16>
    %109 = arith.addf %103, %108 : vector<4x16x256xbf16>
    %110 = arith.mulf %109, %109 : vector<4x16x256xbf16>
    %111 = arith.mulf %109, %110 : vector<4x16x256xbf16>
    %cst_40 = arith.constant 4.467770e-02 : bf16
    %112 = vector.broadcast %cst_40 : bf16 to vector<4x16x256xbf16>
    %113 = arith.mulf %112, %111 : vector<4x16x256xbf16>
    %114 = arith.addf %109, %113 : vector<4x16x256xbf16>
    %cst_41 = arith.constant 7.968750e-01 : bf16
    %115 = vector.broadcast %cst_41 : bf16 to vector<4x16x256xbf16>
    %116 = arith.mulf %115, %114 : vector<4x16x256xbf16>
    %117 = math.tanh %116 : vector<4x16x256xbf16>
    %cst_42 = arith.constant 1.000000e+00 : bf16
    %118 = vector.broadcast %cst_42 : bf16 to vector<4x16x256xbf16>
    %119 = arith.addf %118, %117 : vector<4x16x256xbf16>
    %cst_43 = arith.constant 5.000000e-01 : bf16
    %120 = vector.broadcast %cst_43 : bf16 to vector<4x16x256xbf16>
    %121 = arith.mulf %120, %119 : vector<4x16x256xbf16>
    %122 = arith.mulf %109, %121 : vector<4x16x256xbf16>
    %123 = vector.shape_cast %122 : vector<4x16x256xbf16> to vector<64x256xbf16>
    %c0_44 = arith.constant 0 : index
    %c0_45 = arith.constant 0 : index
    %124 = vector.load %arg7[%c0_44, %c0_45] : memref<256x128xbf16, #tpu.memory_space<vmem>>, vector<256x128xbf16>
    %cst_46 = arith.constant dense<0.000000e+00> : vector<64x128xf32>
    %125 = tpu.matmul %123, %124, %cst_46 {dimension_numbers = #tpu.dot_dimension_numbers<[1], [0], [0], [1], [0, 0, 1, 1], [], []>} : vector<64x256xbf16>, vector<256x128xbf16>, vector<64x128xf32> -> vector<64x128xf32>
    %c0_47 = arith.constant 0 : index
    %c0_48 = arith.constant 0 : index
    %126 = vector.load %arg8[%c0_47, %c0_48] : memref<1x128xf32, #tpu.memory_space<vmem>>, vector<1x128xf32>
    %127 = vector.broadcast %126 : vector<1x128xf32> to vector<64x128xf32>
    %128 = arith.addf %125, %127 : vector<64x128xf32>
    %c0_49 = arith.constant 0 : index
    %c0_50 = arith.constant 0 : index
    %c0_51 = arith.constant 0 : index
    %129 = vector.load %arg9[%c0_49, %c0_50, %c0_51] : memref<1x64x128xf32, #tpu.memory_space<vmem>>, vector<1x64x128xf32>
    %130 = vector.shape_cast %129 : vector<1x64x128xf32> to vector<64x128xf32>
    %131 = vector.shape_cast %128 : vector<64x128xf32> to vector<1x64x128xf32>
    tpu.vector_store %arg9[%c0_49, %c0_50, %c0_51], %131 {strides = array<i32>} : memref<1x64x128xf32, #tpu.memory_space<vmem>>, vector<1x64x128xf32>,
    return
  }
  func.func @transform_0(%arg0: i32, %arg1: i32) -> (i32, i32, i32) {
    %c0_i32 = arith.constant 0 : i32
    %c0_i32_0 = arith.constant 0 : i32
    %c0_i32_1 = arith.constant 0 : i32
    return %arg0, %c0_i32, %c0_i32_0 : i32, i32, i32
  }
  func.func @transform_1(%arg0: i32, %arg1: i32) -> (i32, i32) {
    %c0_i32 = arith.constant 0 : i32
    %c0_i32_0 = arith.constant 0 : i32
    %c0_i32_1 = arith.constant 0 : i32
    return %c0_i32, %c0_i32_0 : i32, i32
  }
  func.func @transform_2(%arg0: i32, %arg1: i32) -> (i32, i32) {
    %c0_i32 = arith.constant 0 : i32
    %c0_i32_0 = arith.constant 0 : i32
    %c0_i32_1 = arith.constant 0 : i32
    return %c0_i32, %c0_i32_0 : i32, i32
  }
  func.func @transform_3(%arg0: i32, %arg1: i32) -> (i32, i32) {
    %c0_i32 = arith.constant 0 : i32
    %c0_i32_0 = arith.constant 0 : i32
    %c0_i32_1 = arith.constant 0 : i32
    return %c0_i32, %c0_i32_0 : i32, i32
  }
  func.func @transform_4(%arg0: i32, %arg1: i32) -> (i32, i32) {
    %c0_i32 = arith.constant 0 : i32
    %c0_i32_0 = arith.constant 0 : i32
    %c0_i32_1 = arith.constant 0 : i32
    return %c0_i32, %c0_i32_0 : i32, i32
  }
  func.func @transform_5(%arg0: i32, %arg1: i32) -> (i32, i32) {
    %c0_i32 = arith.constant 0 : i32
    %c0_i32_0 = arith.constant 0 : i32
    %c0_i32_1 = arith.constant 0 : i32
    return %c0_i32, %c0_i32_0 : i32, i32
  }
  func.func @transform_6(%arg0: i32, %arg1: i32) -> (i32, i32) {
    %c0_i32 = arith.constant 0 : i32
    %c0_i32_0 = arith.constant 0 : i32
    %c0_i32_1 = arith.constant 0 : i32
    return %c0_i32, %c0_i32_0 : i32, i32
  }
  func.func @transform_7(%arg0: i32, %arg1: i32) -> (i32, i32, i32) {
    %c0_i32 = arith.constant 0 : i32
    %c0_i32_0 = arith.constant 0 : i32
    return %arg0, %arg1, %c0_i32 : i32, i32, i32
  }
}

</mosaic_0001>

<bundles_post_ra>
// kernel: mixmlp_forward.1
= control target key start
LH: loop header
LB: loop body
LE: loop exit
PB: predicated region body
PF: predicated region fallthrough
CT: control target
= control target key end

     0   :  { %12 = vsyncpa [#allocation4], 0  ;;  %s3445_s0 = inlined_call_operand.vmem [shape: f32[2,256,128], index: 0, kind: input, shape index: {}]   ;;  %s3446_s1 = inlined_call_operand.vmem [shape: bf16[128,256], index: 1, kind: input, shape index: {}]   ;;  %s3447_s2 = inlined_call_operand.vmem [shape: f32[1,256], index: 2, kind: input, shape index: {}]   ;;  %s3448_s3 = inlined_call_operand.vmem [shape: bf16[9,256], index: 3, kind: input, shape index: {}]   ;;  %s3449_s4 = inlined_call_operand.vmem [shape: bf16[1,256], index: 4, kind: input, shape index: {}]   ;;  %s3450_s5 = inlined_call_operand.vmem [shape: bf16[256,128], index: 5, kind: input, shape index: {}]   ;;  %s3451_s6 = inlined_call_operand.vmem [shape: f32[1,128], index: 6, kind: input, shape index: {}]   ;;  %s3452_s7 = inlined_call_operand.hbm [shape: f32[2,256,128], index: 7, kind: output, shape index: {}]  }
   0x1   :  { %14 = vsyncpa [#allocation4 + $0x1], 0  ;;  %s2556_s24 = smov 0   ;;  %s2558_s25 = smov 0  }
   0x2   :  { %s2560_s26 = smov 0   ;;  %s2562_s27 = smov 0  }
   0x3   :  { %s2564_s28 = smov 0   ;;  %s2566_s29 = smov 0  }
   0x4   :  { %s2568_s30 = smov 0   ;;  %s2570_s8 = smov 0  }
   0x5 LB: > { %s2130_s9 = sadd.s32 4294967295, %s2509_s8   ;;  %s2131_s10 = sadd.s32 4294967294, %s2509_s8   ;;  %s2509_s8 = sphi %s2570_s8, %s20_s8   ;;  %s2505_s30 = sphi %s2568_s30, %s3479_s30   ;;  %s2501_s29 = sphi %s2566_s29, %s3478_s29   ;;  %s2497_s28 = sphi %s2564_s28, %s3477_s28   ;;  %s2493_s27 = sphi %s2562_s27, %s3476_s27   ;;  %s2489_s26 = sphi %s2560_s26, %s3475_s26   ;;  %s2485_s25 = sphi %s2558_s25, %s3474_s25   ;;  %s2481_s24 = sphi %s2556_s24, %s3473_s24  }
   0x6   : > { %s29_s11 = sadd.s32 1, %s2501_s29  ;;  %s32_s12 = sadd.s32 1, %s2505_s30 }
   0x7   : > { %p30_p0 = scmp.ge.s32.totalorder %s29_s11, 4  ;;  %p203_p1 = scmp.ne.s32.totalorder %s2489_s26, %s2485_s25 }
   0x8   : > { %p204_p2 = scmp.eq.s32.totalorder %s2130_s9, 7  ;;  %p209_p5 = scmp.ne.s32.totalorder %s2485_s25, %s2481_s24 }
   0x9   : > { %s3481_s11 = smov (%p30_p0, %s29_s11), 0  ;;  %s3483_s12 = smov (!%p30_p0, %s32_s12), %s2505_s30 }
   0xa   : > { %3455 = sst [smem:[#allocation6_spill]] %s3481_s11  ;;  %s189_s13 = ssub.s32 %s2501_s29, %s3481_s11 }
   0xb   : > { %p2607_p3 = por %p204_p2, %p203_p1  ;;  %p34_p4 = scmp.ge.s32.totalorder %s3483_s12, 2 }
   0xc   : > { %p210_p6 = scmp.eq.s32.totalorder %s2131_s10, 7  ;;  %p2134_p7 = scmp.ge.s32.totalorder %s2509_s8, 1 }
   0xd   : > { %s3485_s12 = smov (%p34_p4, %s3483_s12), 0  ;;  %p254_p9 = scmp.lt.s32.totalorder %s2509_s8, 9 }
   0xe   : > { %3457 = sst [smem:[#allocation7_spill]] %s3485_s12  ;;  %p2616_p8 = por %p210_p6, %p209_p5 }
   0xf   : > { %s188_s16 = ssub.s32 %s2505_s30, %s3485_s12  ;;  %s193_s17 = sadd.s32 1, %s2489_s26 }
  0x10   : > { %s190_s18 = sor.u32 %s189_s13, %s188_s16  ;;  %p255_p10 = pnand %p2134_p7, %p254_p9 }
  0x11   : > { %p191_p11 = scmp.eq.s32.totalorder %s190_s18, 0  ;;  %v2630_v0 = vld [vmem:[%s3446_s1 + $0x4] ss:$8 sps:$4 sm:$0xff] (!%p255_p10)   ;;  %v2635_v1 = vld [vmem:[%s3446_s1] ss:$8 sps:$4 sm:$0xff] (!%p255_p10)   ;;  %v2511_v2 = vmov (!%p255_p10), 0  }
  0x12   : > { %258 = sbr.rel (%p255_p10) target bundleno = 683 (0x2ab), region = 48  ;;  %451 = vmatprep.mubr.bf16.mxu0 (!%p255_p10), %v2511_v2  ;;  %640 = vmatprep.mubr.bf16.mxu1 (!%p255_p10), %v2511_v2  ;;  %v2644_v3 = vld [vmem:[%s3446_s1 + $0x14] ss:$8 sps:$4 sm:$0xff] (!%p255_p10)   ;;  %v2651_v4 = vld [vmem:[%s3446_s1 + $0x10] ss:$8 sps:$4 sm:$0xff] (!%p255_p10)   ;;  %s2661_s20 = sshll.u32 (!%p255_p10), %s2493_s27, 6 }
  0x13   : > { %s2625_s19 = scalar_select %p191_p11, %s2489_s26, %s193_s17  }
  0x14   : > { %419 = vmatprep.subr.bf16.mxu0 (!%p255_p10), %v2630_v0  ;;  %608 = vmatprep.subr.bf16.mxu1 (!%p255_p10), %v2630_v0  ;;  %v2658_v5 = vld [vmem:[%s3446_s1 + $0x24] ss:$8 sps:$4 sm:$0xff] (!%p255_p10)   ;;  %p286_p12 = scmp.lt.s32.totalorder (!%p255_p10), %s2497_s28, 1  ;;  %v2354_v6 = vld [vmem:[%s3446_s1 + $0x20] ss:$8 sps:$4 sm:$0xff] (!%p255_p10)   ;;  %s2163_s23 = sadd.s32 (!%p255_p10), 4294967280, %s2661_s20 }
  0x15   : > { %420 = vmatpush1.bf16.msra.mxu0 (!%p255_p10), %v2635_v1  ;;  %609 = vmatpush1.bf16.msra.mxu1 (!%p255_p10), %v2635_v1  ;;  %v2355_v7 = vld [vmem:[%s3446_s1 + $0x34] ss:$8 sps:$4 sm:$0xff] (!%p255_p10)   ;;  %p602_p13 = scmp.gt.s32.totalorder (!%p255_p10), %s2163_s23, 0  ;;  %v2357_v8 = vld [vmem:[%s3446_s1 + $0x30] ss:$8 sps:$4 sm:$0xff] (!%p255_p10)   ;;  %vm549_vm0 = vcmask (!%p255_p10), 1043459  }
  0x16   : > { %421 = vmatprep.subr.bf16.mxu0 (!%p255_p10), %v2644_v3  ;;  %610 = vmatprep.subr.bf16.mxu1 (!%p255_p10), %v2644_v3  ;;  %v2358_v9 = vld [vmem:[%s3446_s1 + $0x44] ss:$8 sps:$4 sm:$0xff] (!%p255_p10)   ;;  %v2360_v10 = vld [vmem:[%s3446_s1 + $0x40] ss:$8 sps:$4 sm:$0xff] (!%p255_p10)   ;;  %v2361_v11 = vld [vmem:[%s3446_s1 + $0x54] ss:$8 sps:$4 sm:$0xff] (!%p255_p10)  }
  0x17   : > { %v2363_v12 = vld [vmem:[%s3446_s1 + $0x50] ss:$8 sps:$4 sm:$0xff] (!%p255_p10)   ;;  %v2364_v13 = vld [vmem:[%s3446_s1 + $0x64] ss:$8 sps:$4 sm:$0xff] (!%p255_p10)   ;;  %v2366_v14 = vld [vmem:[%s3446_s1 + $0x60] ss:$8 sps:$4 sm:$0xff] (!%p255_p10)  }
  0x18   : > { %v2367_v15 = vld [vmem:[%s3446_s1 + $0x74] ss:$8 sps:$4 sm:$0xff] (!%p255_p10)   ;;  %v2369_v16 = vld [vmem:[%s3446_s1 + $0x70] ss:$8 sps:$4 sm:$0xff] (!%p255_p10)   ;;  %vm550_vm1 = vsmask.f32 (!%p255_p10), 7950 }
  0x19   : > { %422 = vmatpush1.bf16.msra.mxu0 %v2651_v4  ;;  %611 = vmatpush1.bf16.msra.mxu1 %v2651_v4  ;;  %s287_s13 = scalar_select %p286_p12, %s2497_s28, 1  ;;  %vm552_vm2 = vcmask 1047559   ;;  %vm553_vm3 = vsmask.f32 7966  ;;  %vm551_vm4 = vmand %vm549_vm0, %vm550_vm1  ;;  %v559_v35 = vld [vmem:[#allocation2 + $0x30] sm:$0x88] }
  0x1a   : > { %423 = vmatprep.subr.bf16.mxu0 %v2658_v5  ;;  %612 = vmatprep.subr.bf16.mxu1 %v2658_v5  ;;  %s3487_s23 = smov (!%p602_p13, %s2163_s23), 0  ;;  %vm554_vm5 = vmand %vm552_vm2, %vm553_vm3  ;;  %v556_v37 = vld [vmem:[#allocation2 + $0x8] sm:$0x88]  ;;  %v562_v39 = vld [vmem:[#allocation2 + $0x58] sm:$0x88]  ;;  %vm574_vm7 = vcmask 1040384  }
  0x1b   : > { %s2218_s22 = sshll.u32 %s287_s13, 8  ;;  %vm2732_vm6 = vmor %vm554_vm5, %vm551_vm4  ;;  %vm575_vm8 = vsmask.f32 256  ;;  %vm577_vm9 = vcmask 1044484   ;;  %vm578_vm11 = vsmask.f32 4352 }
  0x1c   : > { %s2697_s21 = scalar_lea.vmem %s3445_s0, %s2218_s22  ;;  %v560_v38 = vsel %vm2732_vm6, 0, %v559_v35  ;;  %v557_v40 = vsel %vm2732_vm6, 0, %v556_v37  ;;  %v563_v41 = vsel %vm2732_vm6, 0, %v562_v39  ;;  %vm576_vm10 = vmand %vm574_vm7, %vm575_vm8  ;;  %v584_v42 = vld [vmem:[#allocation2 + $0x48] sm:$0x11]  ;;  %v2370_v55 = vld [vmem:[%s3450_s5 + $0x40] sm:$0xff]  }
  0x1d   : > { %424 = vmatpush1.bf16.msra.mxu0 %v2354_v6  ;;  %613 = vmatpush1.bf16.msra.mxu1 %v2354_v6  ;;  %s2707_s18 = scalar_lea.vmem %s2697_s21, %s2661_s20  ;;  %s604_s22 = scalar_lea.vmem %s2697_s21, %s3487_s23  ;;  %561 = vst [vmem:[#allocation2 + $0x30] sm:$0x88] %v560_v38  ;;  %558 = vst [vmem:[#allocation2 + $0x8] sm:$0x88] %v557_v40  ;;  %v587_v45 = vld [vmem:[#allocation2 + $0x70] sm:$0x11] }
  0x1e   : > { %425 = vmatprep.subr.bf16.mxu0 %v2355_v7  ;;  %614 = vmatprep.subr.bf16.mxu1 %v2355_v7  ;;  %v316_v17 = vld [vmem:[%s2707_s18] sm:$0xff]  ;;  %v317_v18 = vld [vmem:[%s2707_s18 + $0x8] sm:$0xff]  ;;  %v318_v23 = vld [vmem:[%s2707_s18 + $0x10] sm:$0xff]  ;;  %s672_s23 = sadd.s32 64, %s2661_s20  ;;  %564 = vst [vmem:[#allocation2 + $0x58] sm:$0x88] %v563_v41 }
  0x1f   : > { %v605_v19 = vld [vmem:[%s604_s22] sm:$0xff]  ;;  %v606_v20 = vld [vmem:[%s604_s22 + $0x8] sm:$0xff]  ;;  %v324_v21 = vpack.c.bf16 %v317_v18, %v316_v17  ;;  %v319_v24 = vld [vmem:[%s2707_s18 + $0x18] sm:$0xff]  ;;  %p673_p0 = scmp.lt.s32.totalorder %s672_s23, 240  ;;  %p599_p1 = scmp.gt.s32.totalorder %s2493_s27, 0  ;;  %vm1350_vm1 = vcmask 1042432  }
  0x20   : > { %v607_v22 = vpack.c.bf16 %v606_v20, %v605_v19  ;;  %v325_v25 = vpack.c.bf16 %v319_v24, %v318_v23  ;;  %v320_v26 = vld [vmem:[%s2707_s18 + $0x20] sm:$0xff]  ;;  %v321_v27 = vld [vmem:[%s2707_s18 + $0x28] sm:$0xff]  ;;  %v322_v29 = vld [vmem:[%s2707_s18 + $0x30] sm:$0xff]  ;;  %p670_p2 = scmp.lt.s32.totalorder %s2493_s27, 3  ;;  %vm959_vm14 = vsmask.f32 3328 }
  0x21   : > { %426 = vmatpush1.bf16.msra.mxu0 %v2357_v8  ;;  %615 = vmatpush1.bf16.msra.mxu1 %v2357_v8  ;;  %v326_v28 = vpack.c.bf16 %v321_v27, %v320_v26  ;;  %v323_v30 = vld [vmem:[%s2707_s18 + $0x38] sm:$0xff]  ;;  %s3489_s23 = smov (!%p673_p0, %s672_s23), 240  ;;  %vm579_vm12 = vmand %vm577_vm9, %vm578_vm11  ;;  %v581_v47 = vld [vmem:[#allocation2 + $0x20] sm:$0x11]  ;;  %vm960_vm15 = vsmask.f32 7440 }
  0x22   : > { %427 = vmatprep.subr.bf16.mxu0 %v2358_v9  ;;  %616 = vmatprep.subr.bf16.mxu1 %v2358_v9  ;;  %v327_v31 = vpack.c.bf16 %v323_v30, %v322_v29  ;;  %s675_s12 = scalar_lea.vmem %s2697_s21, %s3489_s23  ;;  %vm2743_vm13 = vmor %vm579_vm12, %vm576_vm10  ;;  %v590_v49 = vld [vmem:[#allocation2 + $0x98] sm:$0x11]  ;;  %v565_v51 = vld [vmem:[#allocation2 + $0x80] sm:$0x88]  ;;  %vm1351_vm2 = vcmask 1046532   ;;  %s283_s18 = sand.u32 1, %s2485_s25  }
  0x23   : > { %v676_v32 = vld [vmem:[%s675_s12] sm:$0xff]  ;;  %v677_v33 = vld [vmem:[%s675_s12 + $0x8] sm:$0xff]  ;;  %v585_v44 = vsel %vm2743_vm13, 0, %v584_v42  ;;  %v588_v46 = vsel %vm2743_vm13, 0, %v587_v45  ;;  %v582_v48 = vsel %vm2743_vm13, 0, %v581_v47  ;;  %v591_v50 = vsel %vm2743_vm13, 0, %v590_v49  ;;  %vm3019_vm0 = vmor %vm959_vm14, %vm960_vm15 }
  0x24   : > { %v678_v34 = vpack.c.bf16 %v677_v33, %v676_v32  ;;  %586 = vst [vmem:[#allocation2 + $0x48] sm:$0x11] %v585_v44  ;;  %589 = vst [vmem:[#allocation2 + $0x70] sm:$0x11] %v588_v46  ;;  %v566_v52 = vsel %vm2732_vm6, 0, %v565_v51  ;;  %v2371_v56 = vld [vmem:[%s3450_s5] sm:$0xff]  }
  0x25   : > { %428 = vmatpush1.bf16.msra.mxu0 %v2360_v10  ;;  %617 = vmatpush1.bf16.msra.mxu1 %v2360_v10  ;;  %583 = vst [vmem:[#allocation2 + $0x20] sm:$0x11] %v582_v48  ;;  %592 = vst [vmem:[#allocation2 + $0x98] sm:$0x11] %v591_v50  ;;  %v593_v53 = vld [vmem:[#allocation2 + $0xc0] sm:$0x11] }
  0x26   : > { %429 = vmatprep.subr.bf16.mxu0 %v2361_v11  ;;  %618 = vmatprep.subr.bf16.mxu1 %v2361_v11  ;;  %567 = vst [vmem:[#allocation2 + $0x80] sm:$0x88] %v566_v52  ;;  %v594_v54 = vsel %vm2743_vm13, 0, %v593_v53  ;;  %v2372_v57 = vld [vmem:[%s3450_s5 + $0x48] sm:$0xff]   ;;  %v2374_v59 = vld [vmem:[%s3450_s5 + $0x50] sm:$0xff]   ;;  %v2376_v61 = vld [vmem:[%s3450_s5 + $0x58] sm:$0xff]  }
  0x27   : > { %595 = vst [vmem:[#allocation2 + $0xc0] sm:$0x11] %v594_v54  ;;  %v2373_v58 = vld [vmem:[%s3450_s5 + $0x8] sm:$0xff]   ;;  %v2375_v60 = vld [vmem:[%s3450_s5 + $0x10] sm:$0xff]   ;;  %v742_v18 = vld [vmem:[%s3448_s3] sm:$0xff]  ;;  %s2135_s22 = sshll.u32 %s283_s18, 6 }
  0x28   : > { %v596_v62 = vld [vmem:[#allocation2 + $0xe8] sm:$0x11]  ;;  %v2171_v19 = vld.sshfl [vmem:[%s3449_s4] sm:$0x11 pattern:$0x75316420]  ;;  %v2168_v20 = vcombine.low %v742_v18, %v742_v18  ;;  %vm3050_vm3 = vmor %vm1350_vm1, %vm1351_vm2 }
  0x29   : > { %430 = vmatpush1.bf16.msra.mxu0 %v2363_v12  ;;  %619 = vmatpush1.bf16.msra.mxu1 %v2363_v12  ;;  %v597_v63 = vsel %vm2743_vm13, 0, %v596_v62  ;;  %v745_v42 = vld [vmem:[#allocation2 + $0x8] sm:$0x88]  ;;  %v748_v49 = vld [vmem:[#allocation2 + $0x30] sm:$0x88]  ;;  %s3371_s23 = scalar_lea.vmem [#allocation3], %s2135_s22 }
  0x2a   : > { %431 = vmatprep.subr.bf16.mxu0 %v2364_v13  ;;  %620 = vmatprep.subr.bf16.mxu1 %v2364_v13  ;;  %598 = vst [vmem:[#allocation2 + $0xe8] sm:$0x11] %v597_v63  ;;  %v855_v26 = vshrl.u32 %v2168_v20, 16  ;;  %v2821_v29 = vpack.i.b16 %v2168_v20, %v2168_v20  ;;  %v314_v52 = vld [vmem:[%s3447_s2] sm:$0x3]  ;;  %s2213_s12 = sshll.u32 %s2493_s27, 3 }
  0x2b   : > { %s600_s16 = scalar_select %p599_p1, 1.0, 0.0  ;;  %vm1704_vm4 = vsmask.f32 4368 }
  0x2c   : > { %s671_s17 = scalar_select %p670_p2, 1.0, 0.0  ;;  %vm3169_vm5 = vmor %vm575_vm8, %vm1704_vm4 }
  0x2d   : > { %432 = vmatpush1.bf16.msra.mxu0 %v2366_v14  ;;  %621 = vmatpush1.bf16.msra.mxu1 %v2366_v14  ;;  %s2214_s20 = sshll.u32 %s2497_s28, 5  ;;  %s2050_s10 = sshll.u32 %s3371_s23, 4  ;;  %s3387_s10 = int_to_ptr.vmem [resolvable:$true] %s2050_s10 }
  0x2e   : > { %433 = vmatprep.subr.bf16.mxu0 %v2367_v15  ;;  %622 = vmatprep.subr.bf16.mxu1 %v2367_v15  ;;  %s2047_s21 = sadd.s32 %s2214_s20, %s2213_s12  ;;  %s3393_s27 = scalar_lea.sflag [#allocation4], %s283_s18 }
  0x2f   : > { %s2215_s9 = sshll.u32 %s2047_s21, 7  ;;  %s2415_s28 = scalar_lea.vmem %s3387_s10, 1024 }
  0x30   : > { %s3385_s22 = scalar_lea.hbm %s3452_s7, %s2215_s9  ;;  %p2416_p4 = scmp.ne.s32.totalorder %s3387_s10, %s2415_s28 }
  0x31   : > { %434 = vmatpush1.bf16.msra.mxu0 %v2369_v16  ;;  %623 = vmatpush1.bf16.msra.mxu1 %v2369_v16  ;;  %s2513_s13 = smov [#allocation3]  }
  0x32   : > { %679 = vmatprep.subr.bf16.mxu0 %v2630_v0  ;;  %2231 = vmatprep.subr.bf16.mxu1 %v2370_v55  ;;  %v2377_v0 = vld [vmem:[%s3450_s5 + $0x18] sm:$0xff]   ;;  %p2417_p5 = pnand %p2416_p4, %p2607_p3  ;;  %s2419_s11 = sshll.u32 %s2513_s13, 4  ;;  %s2420_s11 = int_to_ptr.vmem [resolvable:$false] %s2419_s11 }
  0x33   : > { %s2421_s12 = scalar_lea.vmem %s2420_s11, 2048  ;;  %p2422_p7 = scmp.lt.s32.totalorder %s3387_s10, %s2420_s11 }
  0x34   : > { %452 = vmatmul.mubr.bf16.vlgmr.msra.gmra.mrb[0].mxu0 %v324_v21  ;;  %641 = vmatmul.mubr.bf16.vlgmr.msra.gmra.mrb[0].mxu1 %v607_v22  ;;  %v2169_v21 = vcombine.high %v742_v18, %v742_v18  ;;  %v808_v22 = vcombine.high %v2171_v19, %v2171_v19  ;;  %p2418_p6 = pneg %p2417_p5  ;;  %p2423_p9 = scmp.lt.s32.totalorder %s2421_s12, %s2415_s28 }
  0x35   : > { %680 = vmatpush1.bf16.msra.mxu0 %v2635_v1  ;;  %461 = vmatprep.mubr.bf16.mxu0 %v2511_v2  ;;  %v2378_v1 = vld [vmem:[%s3450_s5 + $0x60] sm:$0xff]  }
  0x36   : > { %681 = vmatprep.subr.bf16.mxu0 %v2644_v3  ;;  %2232 = vmatpush3.bf16.msra.mxu1 %v2371_v56  ;;  %v2380_v3 = vld [vmem:[%s3450_s5 + $0x68] sm:$0xff]   ;;  %v862_v27 = vshrl.u32 %v2169_v21, 16  ;;  %v2823_v30 = vpack.i.b16 %v2169_v21, %v2169_v21  ;;  %p2424_p10 = por %p2423_p9, %p2422_p7 }
  0x37   : > { %2233 = vmatprep.subr.bf16.mxu1 %v2372_v57 }
  0x38   : > { %v2830_v35 = vpack.i.b16 %v862_v27, %v862_v27  ;;  %p2425_p11 = pnand %p2424_p10, %p2418_p6 }
  0x39   : > { %682 = vmatpush1.bf16.msra.mxu0 %v2651_v4  ;;  %v568_v4 = vld [vmem:[#allocation2 + $0xa8] sm:$0x88] }
  0x3a   : > { %683 = vmatprep.subr.bf16.mxu0 %v2658_v5  ;;  %2234 = vmatpush3.bf16.msra.mxu1 %v2373_v58  ;;  %v569_v5 = vsel %vm2732_vm6, 0, %v568_v4 }
  0x3b   : > { %2235 = vmatprep.subr.bf16.mxu1 %v2374_v59  ;;  %570 = vst [vmem:[#allocation2 + $0xa8] sm:$0x88] %v569_v5  ;;  %v751_v59 = vld [vmem:[#allocation2 + $0x58] sm:$0x88] }
  0x3c   : > { %462 = vmatmul.mubr.bf16.gmra.mrb[4].mxu0 %v325_v25 }
  0x3d   : > { %684 = vmatpush1.bf16.msra.mxu0 %v2354_v6  ;;  %471 = vmatprep.mubr.bf16.mxu0 %v2511_v2  ;;  %v2381_v6 = vld [vmem:[%s3450_s5 + $0x28] sm:$0xff]  }
  0x3e   : > { %685 = vmatprep.subr.bf16.mxu0 %v2355_v7  ;;  %2236 = vmatpush3.bf16.msra.mxu1 %v2375_v60  ;;  %v2382_v7 = vld [vmem:[%s3450_s5 + $0x70] sm:$0xff]  }
  0x3f   : > { %2237 = vmatprep.subr.bf16.mxu1 %v2376_v61 }
  0x41   : > { %686 = vmatpush1.bf16.msra.mxu0 %v2357_v8  ;;  %v2383_v8 = vld [vmem:[%s3450_s5 + $0x30] sm:$0xff]  }
  0x42   : > { %687 = vmatprep.subr.bf16.mxu0 %v2358_v9  ;;  %2238 = vmatpush3.bf16.msra.mxu1 %v2377_v0  ;;  %v2384_v9 = vld [vmem:[%s3450_s5 + $0x78] sm:$0xff]  }
  0x43   : > { %2239 = vmatprep.subr.bf16.mxu1 %v2378_v1 }
  0x44   : > { %472 = vmatmul.mubr.bf16.gmra.mrb[8].mxu0 %v326_v28 }
  0x45   : > { %688 = vmatpush1.bf16.msra.mxu0 %v2360_v10  ;;  %481 = vmatprep.mubr.bf16.mxu0 %v2511_v2  ;;  %v2385_v10 = vld [vmem:[%s3450_s5 + $0x38] sm:$0xff]  }
  0x46   : > { %689 = vmatprep.subr.bf16.mxu0 %v2361_v11  ;;  %v329_v11 = vlaneseq }
  0x49   : > { %690 = vmatpush1.bf16.msra.mxu0 %v2363_v12  ;;  %v2512_v12 = vmov 1966171168  }
  0x4a   : > { %691 = vmatprep.subr.bf16.mxu0 %v2364_v13  ;;  %v810_v13 = vunpack.c.l.s4 %v2512_v12  ;;  %v1307_v12 = vld [vmem:[#allocation2 + $0x48] sm:$0x11] }
  0x4c   : > { %482 = vmatmul.mubr.bf16.gmra.mrb[12].mxu0 %v327_v31  ;;  %v811_v17 = vunpack.c.0.s8 %v810_v13  ;;  %v743_v31 = vld [vmem:[%s3448_s3 + $0x8] sm:$0x11]  ;;  %v1308_v13 = vld [vmem:[#allocation2 + $0x70] sm:$0x11] }
  0x4d   : > { %692 = vmatpush1.bf16.msra.mxu0 %v2366_v14  ;;  %711 = vmatprep.mubr.bf16.mxu0 %v2511_v2  ;;  %v2379_v2 = vld [vmem:[%s3450_s5 + $0x20] sm:$0xff]   ;;  %v571_v14 = vld [vmem:[#allocation2 + $0xd0] sm:$0x88]  ;;  %v2180_v39 = vcombine.low %v743_v31, %v743_v31  ;;  %v2181_v40 = vcombine.high %v743_v31, %v743_v31 }
  0x4e   : > { %693 = vmatprep.subr.bf16.mxu0 %v2367_v15  ;;  %2240 = vmatpush3.bf16.msra.mxu1 %v2379_v2  ;;  %v572_v15 = vsel %vm2732_vm6, 0, %v571_v14  ;;  %v1306_v14 = vld [vmem:[#allocation2 + $0x20] sm:$0x11] }
  0x4f   : > { %2241 = vmatprep.subr.bf16.mxu1 %v2380_v3  ;;  %573 = vst [vmem:[#allocation2 + $0xd0] sm:$0x88] %v572_v15  ;;  %v1501_v50 = vpack.i.b16 %v2180_v39, %v2180_v39  ;;  %v1508_v51 = vpack.i.b16 %v2181_v40, %v2181_v40 }
  0x51   : > { %694 = vmatpush1.bf16.msra.mxu0 %v2369_v16  ;;  %v330_v16 = vshrl.u32 %v329_v11, 7 }
  0x52   : > { %2242 = vmatpush3.bf16.msra.mxu1 %v2381_v6 }
  0x53   : > { %2243 = vmatprep.subr.bf16.mxu1 %v2382_v7  ;;  %v814_v23 = vsub.s32 %v811_v17, %v330_v16  ;;  %v2819_v28 = vsub.s32 0, %v330_v16  ;;  %v335_v38 = vsub.s32 1, %v330_v16  ;;  %v2836_v41 = vsub.s32 3, %v330_v16  ;;  %v754_v17 = vld [vmem:[#allocation2 + $0x80] sm:$0x88] }
  0x54   : > { %712 = vmatmul.mubr.bf16.vlgmr.msra.gmra.mrb[16].mxu0 %v678_v34  ;;  %v2828_v34 = vpack.i.b16 %v855_v26, %v855_v26  ;;  %v2844_v48 = vsub.s32 2, %v330_v16 }
  0x55   : > { %v815_v24 = vrot.slane %v2171_v19, %v814_v23  ;;  %v822_v25 = vrot.slane %v808_v22, %v814_v23  ;;  %v774_v36 = vrot.slane %v2821_v29, %v2819_v28  ;;  %v781_v37 = vrot.slane %v2823_v30, %v2819_v28 }
  0x56   : > { %2244 = vmatpush3.bf16.msra.mxu1 %v2383_v8  ;;  %v861_v45 = vrot.slane %v2828_v34, %v335_v38  ;;  %v868_v46 = vrot.slane %v2830_v35, %v335_v38  ;;  %v902_v54 = vrot.slane %v2821_v29, %v2836_v41  ;;  %v906_v57 = vrot.slane %v2823_v30, %v2836_v41 }
  0x57   : > { %2245 = vmatprep.subr.bf16.mxu1 %v2384_v9  ;;  %v824_v32 = vpack.i.b16 %v815_v24, %v815_v24  ;;  %v831_v33 = vpack.i.b16 %v822_v25, %v822_v25  ;;  %v2842_v47 = vcombine.low %v774_v36, %v781_v37  ;;  %v1315_v58 = vrot.slane %v2821_v29, %v335_v38  ;;  %v2911_v37 = vld [vmem:[#allocation2 + $0x98] sm:$0x11] }
  0x58   : > { %v2855_v56 = vcombine.low %v861_v45, %v868_v46  ;;  %v1319_v60 = vrot.slane %v2823_v30, %v335_v38  ;;  %v1408_v61 = vrot.slane %v2828_v34, %v2844_v48  ;;  %v1412_v62 = vrot.slane %v2830_v35, %v2844_v48 }
  0x59   : > { %v829_v43 = vrot.slane %v824_v32, %v2819_v28  ;;  %v836_v44 = vrot.slane %v831_v33, %v2819_v28  ;;  %v788_v53 = vmul.bf16 %v2842_v47, %v745_v42  ;;  %v791_v63 = vmul.bf16 %v2842_v47, %v748_v49 }
  0x5a   : > { %2246 = vmatpush3.bf16.msra.mxu1 %v2385_v10  ;;  %v2867_v0 = vrot.slane %v314_v52, %v2819_v28  ;;  %v1506_v1 = vrot.slane %v1501_v50, %v2819_v28  ;;  %v1513_v2 = vrot.slane %v1508_v51, %v2819_v28  ;;  %v794_v3 = vmul.bf16 %v2842_v47, %v751_v59  ;;  %v1310_v50 = vld [vmem:[#allocation2 + $0xc0] sm:$0x11] }
  0x5b   : > { %v2853_v55 = vcombine.low %v829_v43, %v836_v44  ;;  %v2872_v4 = vrot.slane %v314_v52, %v335_v38  ;;  %v875_v6 = vmul.bf16 %v2855_v56, %v748_v49  ;;  %v940_v7 = vrot.slane %v2828_v34, %v2819_v28  ;;  %v760_v52 = vld [vmem:[#allocation2 + $0xd0] sm:$0x88] }
  0x5c   : > { %v2880_v8 = vcombine.low %v902_v54, %v906_v57  ;;  %v944_v9 = vrot.slane %v2830_v35, %v2819_v28  ;;  %v1065_v10 = vrot.slane %v2821_v29, %v2844_v48  ;;  %v1069_v11 = vrot.slane %v2823_v30, %v2844_v48  ;;  %v757_v28 = vld [vmem:[#allocation2 + $0xa8] sm:$0x88] }
  0x5d   : > { %v843_v5 = vadd.bf16 %v2853_v55, %v788_v53  ;;  %v2889_v15 = vcombine.low %v1315_v58, %v1319_v60  ;;  %v2891_v16 = vcombine.low %v1408_v61, %v1412_v62  ;;  %v846_v18 = vadd.bf16 %v2853_v55, %v791_v63 }
  0x5e   : > { %v878_v19 = vmul.bf16 %v2855_v56, %v751_v59  ;;  %v2895_v20 = vcombine.low %v1506_v1, %v1513_v2  ;;  %v849_v21 = vadd.bf16 %v2853_v55, %v794_v3  ;;  %v881_v22 = vmul.bf16 %v2855_v56, %v754_v17 }
  0x5f   : > { %v797_v23 = vmul.bf16 %v2842_v47, %v754_v17  ;;  %v887_v24 = vadd.bf16 %v875_v6, %v843_v5  ;;  %v913_v25 = vmul.bf16 %v2880_v8, %v751_v59  ;;  %v1187_v26 = vrot.slane %v2828_v34, %v2836_v41 }
  0x60   : > { %v1191_v27 = vrot.slane %v2830_v35, %v2836_v41  ;;  %v651_v29 = vstv %s600_s16  ;;  %v1328_v30 = vmul.bf16 %v2889_v15, %v1306_v14  ;;  %v1421_v31 = vmul.bf16 %v2891_v16, %v1307_v12 }
  0x61   : > { %v1522_v32 = vmul.bf16 %v2895_v20, %v1308_v13  ;;  %v890_v33 = vadd.bf16 %v878_v19, %v846_v18  ;;  %v916_v36 = vmul.bf16 %v2880_v8, %v754_v17  ;;  %v1331_v34 = vmul.bf16 %v2889_v15, %v1307_v12 }
  0x62   : > { %v1424_v38 = vmul.bf16 %v2891_v16, %v1308_v13  ;;  %v893_v35 = vadd.bf16 %v881_v22, %v849_v21  ;;  %v919_v39 = vmul.bf16 %v2880_v8, %v757_v28  ;;  %v852_v40 = vadd.bf16 %v2853_v55, %v797_v23 }
  0x63   : > { %v884_v41 = vmul.bf16 %v2855_v56, %v757_v28  ;;  %v2918_v42 = vadd.bf16 %v913_v25, %v887_v24  ;;  %v2920_v43 = vcombine.low %v940_v7, %v944_v9  ;;  %v2922_v44 = vcombine.low %v1065_v10, %v1069_v11 }
  0x64   : > { %v2924_v45 = vcombine.low %v1187_v26, %v1191_v27  ;;  %v2926_v46 = vrot.slane %v1328_v30, 5  ;;  %v2928_v48 = vrot.slane %v1421_v31, 5  ;;  %v1525_v49 = vmul.bf16 %v2895_v20, %v2911_v37 }
  0x65   : > { %v1334_v51 = vmul.bf16 %v2889_v15, %v1308_v13  ;;  %v2933_v53 = vstv %s671_s17  ;;  %v2935_v54 = vrot.slane %v1522_v32, 5  ;;  %v2937_v57 = vadd.bf16 %v916_v36, %v890_v33 }
  0x66   : > { %v1427_v58 = vmul.bf16 %v2891_v16, %v2911_v37  ;;  %v2941_v61 = vrot.slane %v1331_v34, 5  ;;  %v2943_v62 = vrot.slane %v1424_v38, 5  ;;  %v2945_v63 = vadd.bf16 %v919_v39, %v893_v35 }
  0x67   : > { %v896_v1 = vadd.bf16 %v884_v41, %v852_v40  ;;  %v1528_v7 = vmul.bf16 %v2895_v20, %v1310_v50  ;;  %v922_v9 = vmul.bf16 %v2880_v8, %v760_v52  ;;  %v2953_v14 = vrot.slane %v1525_v49, 5 }
  0x68   : > { %v2955_v17 = vrot.slane %v1334_v51, 5  ;;  %v2959_v24 = vrot.slane %v1427_v58, 5 }
  0x69   : > { %v2965_v31 = vrot.slane %v1528_v7, 5  ;;  %v2967_v32 = vadd.bf16 %v922_v9, %v896_v1 }
 0x107   : > { %v453_v59 = vpop.f32.mrb[0].mxu0  ;;  %v642_v60 = vpop.f32.mrb[0].mxu1 }
 0x108   : > { %v454_v2 = vadd.f32 %v453_v59, %v2867_v0  ;;  %v643_v3 = vadd.f32 %v642_v60, %v2867_v0  ;;  %v455_v5 = vpop.f32.mrb[1].mxu0  ;;  %v644_v6 = vpop.f32.mrb[1].mxu1 }
 0x109   : > { %v456_v10 = vadd.f32 %v455_v5, %v2872_v4  ;;  %v645_v11 = vadd.f32 %v644_v6, %v2872_v4  ;;  %v457_v12 = vpop.f32.mrb[2].mxu0  ;;  %v646_v13 = vpop.f32.mrb[2].mxu1 }
 0x10a   : > { %v652_v18 = vmul.f32 %v651_v29, %v643_v3  ;;  %v458_v19 = vadd.f32 %v457_v12, %v2867_v0  ;;  %v647_v21 = vadd.f32 %v646_v13, %v2867_v0  ;;  %v459_v22 = vpop.f32.mrb[3].mxu0  ;;  %v648_v23 = vpop.f32.mrb[3].mxu1 }
 0x10b   : > { %v2961_v25 = vpack.c.bf16 %v456_v10, %v454_v2  ;;  %v653_v26 = vmul.f32 %v651_v29, %v645_v11  ;;  %v460_v27 = vadd.f32 %v459_v22, %v2872_v4  ;;  %v649_v28 = vadd.f32 %v648_v23, %v2872_v4 }
 0x10c   : > { %v654_v30 = vmul.f32 %v651_v29, %v647_v21 }
 0x10d   : > { %v2971_v36 = vpack.c.bf16 %v653_v26, %v652_v18  ;;  %v2973_v34 = vpack.c.bf16 %v460_v27, %v458_v19  ;;  %v655_v38 = vmul.f32 %v651_v29, %v649_v28  ;;  %v876_v35 = vmul.bf16 %v2961_v25, %v2855_v56 }
 0x10e   : > { %v1076_v39 = vmul.bf16 %v2961_v25, %v2922_v44  ;;  %v1419_v40 = vmul.bf16 %v2961_v25, %v2891_v16  ;;  %v2985_v49 = vmul.bf16 %v2961_v25, %v2920_v43 }
 0x10f   : > { %v2987_v50 = vpack.c.bf16 %v655_v38, %v654_v30  ;;  %v463_v29 = vpop.f32.mrb[4].mxu0  ;;  %v789_v51 = vmul.bf16 %v2971_v36, %v2842_v47  ;;  %v877_v52 = vmul.bf16 %v2973_v34, %v2855_v56  ;;  %v951_v58 = vmul.bf16 %v2971_v36, %v2920_v43 }
 0x110   : > { %v464_v59 = vadd.f32 %v463_v29, %v2867_v0  ;;  %v465_v60 = vpop.f32.mrb[5].mxu0  ;;  %v1077_v1 = vmul.bf16 %v2973_v34, %v2922_v44  ;;  %v1085_v2 = vshll.u32 %v1076_v39, 16  ;;  %v1088_v3 = vshrl.u32 %v1076_v39, 16 }
 0x111   : > { %v466_v5 = vadd.f32 %v465_v60, %v2872_v4  ;;  %v467_v6 = vpop.f32.mrb[6].mxu0  ;;  %v790_v7 = vmul.bf16 %v2987_v50, %v2842_v47  ;;  %v844_v9 = vadd.bf16 %v2853_v55, %v789_v51  ;;  %v952_v10 = vmul.bf16 %v2987_v50, %v2920_v43 }
 0x112   : > { %v468_v11 = vadd.f32 %v467_v6, %v2867_v0  ;;  %v469_v12 = vpop.f32.mrb[7].mxu0  ;;  %v963_v13 = vshll.u32 %v951_v58, 16  ;;  %v966_v18 = vshrl.u32 %v951_v58, 16  ;;  %v1087_v19 = vrot.slane %v1085_v2, 5 }
 0x113   : > { %v3005_v21 = vpack.c.bf16 %v466_v5, %v464_v59  ;;  %v470_v22 = vadd.f32 %v469_v12, %v2872_v4  ;;  %v845_v23 = vadd.bf16 %v2853_v55, %v790_v7  ;;  %v888_v26 = vadd.bf16 %v876_v35, %v844_v9 }
 0x114   : > { %v965_v27 = vrot.slane %v963_v13, 5  ;;  %v968_v28 = vrot.slane %v966_v18, 4  ;;  %v972_v30 = vshll.u32 %v952_v10, 16  ;;  %v976_v38 = vshrl.u32 %v952_v10, 16 }
 0x115   : > { %v3009_v39 = vpack.c.bf16 %v470_v22, %v468_v11  ;;  %v889_v29 = vadd.bf16 %v877_v52, %v845_v23  ;;  %v914_v51 = vmul.bf16 %v3005_v21, %v2880_v8  ;;  %v1090_v60 = vrot.slane %v1088_v3, 4 }
 0x116   : > { %v969_v58 = vor.u32 %v968_v28, %v965_v27  ;;  %v974_v2 = vrot.slane %v972_v30, 5  ;;  %v978_v59 = vrot.slane %v976_v38, 4  ;;  %v1050_v5 = vadd.bf16 %v965_v27, %v2918_v42 }
 0x117   : > { %v473_v6 = vpop.f32.mrb[8].mxu0  ;;  %v915_v35 = vmul.bf16 %v3009_v39, %v2880_v8  ;;  %v926_v7 = vadd.bf16 %v914_v51, %v888_v26  ;;  %v1091_v9 = vor.u32 %v1090_v60, %v1087_v19  ;;  %v1094_v12 = vshll.u32 %v1077_v1, 16 }
 0x118   : > { %v474_v10 = vadd.f32 %v473_v6, %v2867_v0  ;;  %v475_v11 = vpop.f32.mrb[9].mxu0  ;;  %v970_v3 = vrot.slane %v969_v58, 4  ;;  %v979_v13 = vor.u32 %v978_v59, %v974_v2  ;;  %v1098_v18 = vshrl.u32 %v1077_v1, 16 }
 0x119   : > { %v476_v42 = vadd.f32 %v475_v11, %v2872_v4  ;;  %v477_v22 = vpop.f32.mrb[10].mxu0  ;;  %v927_v23 = vadd.bf16 %v915_v35, %v889_v29  ;;  %v1092_v26 = vrot.slane %v1091_v9, 4  ;;  %v1096_v27 = vrot.slane %v1094_v12, 5 }
 0x11a   : > { %v478_v28 = vadd.f32 %v477_v22, %v2867_v0  ;;  %v479_v30 = vpop.f32.mrb[11].mxu0  ;;  %v975_v38 = vsel %vm3019_vm0, %v970_v3, %v974_v2  ;;  %v980_v51 = vrot.slane %v979_v13, 4  ;;  %v1100_v60 = vrot.slane %v1098_v18, 4 }
 0x11b   : > { %v3027_v6 = vpack.c.bf16 %v476_v42, %v474_v10  ;;  %v480_v1 = vadd.f32 %v479_v30, %v2872_v4  ;;  %v1051_v58 = vadd.bf16 %v975_v38, %v926_v7  ;;  %v1097_v59 = vsel %vm3019_vm0, %v1092_v26, %v1096_v27 }
 0x11c   : > { %v1052_v11 = vadd.bf16 %v980_v51, %v927_v23  ;;  %v1101_v29 = vor.u32 %v1100_v60, %v1096_v27  ;;  %v1172_v35 = vadd.bf16 %v1087_v19, %v1050_v5  ;;  %v1198_v9 = vmul.bf16 %v3005_v21, %v2924_v45 }
 0x11d   : > { %v3034_v12 = vpack.c.bf16 %v480_v1, %v478_v28  ;;  %v1173_v22 = vadd.bf16 %v1097_v59, %v1051_v58  ;;  %v1199_v2 = vmul.bf16 %v3009_v39, %v2924_v45  ;;  %v1326_v10 = vmul.bf16 %v2971_v36, %v2889_v15 }
 0x11e   : > { %v1102_v3 = vrot.slane %v1101_v29, 4  ;;  %v1207_v7 = vshll.u32 %v1198_v9, 16  ;;  %v1210_v13 = vshrl.u32 %v1198_v9, 16  ;;  %v1327_v18 = vmul.bf16 %v2987_v50, %v2889_v15 }
 0x11f   : > { %v483_v42 = vpop.f32.mrb[12].mxu0  ;;  %v1216_v19 = vshll.u32 %v1199_v2, 16  ;;  %v1220_v5 = vshrl.u32 %v1199_v2, 16  ;;  %v1353_v23 = vrot.slane %v1326_v10, 5  ;;  %v1420_v26 = vmul.bf16 %v2973_v34, %v2891_v16 }
 0x120   : > { %v484_v27 = vadd.f32 %v483_v42, %v2867_v0  ;;  %v485_v28 = vpop.f32.mrb[13].mxu0  ;;  %v1174_v30 = vadd.bf16 %v1102_v3, %v1052_v11  ;;  %v1209_v38 = vrot.slane %v1207_v7, 5  ;;  %v1212_v51 = vrot.slane %v1210_v13, 4 }
 0x121   : > { %v486_v36 = vadd.f32 %v485_v28, %v2872_v4  ;;  %v487_v60 = vpop.f32.mrb[14].mxu0  ;;  %v1218_v1 = vrot.slane %v1216_v19, 5  ;;  %v1222_v58 = vrot.slane %v1220_v5, 4  ;;  %v1354_v59 = vrot.slane %v1353_v23, 4 }
 0x122   : > { %v488_v50 = vadd.f32 %v487_v60, %v2867_v0  ;;  %v489_v29 = vpop.f32.mrb[15].mxu0  ;;  %v1213_v9 = vor.u32 %v1212_v51, %v1209_v38  ;;  %v1294_v2 = vadd.bf16 %v1209_v38, %v1172_v35  ;;  %v1355_v10 = vrot.slane %v1327_v18, 5 }
 0x123   : > { %v2225_v33 = vpack.c.bf16 %v486_v36, %v484_v27  ;;  %v490_v41 = vadd.f32 %v489_v29, %v2872_v4  ;;  %v1223_v42 = vor.u32 %v1222_v58, %v1218_v1  ;;  %v1443_v3 = vrot.slane %v1419_v40, 5 }
 0x124   : > { %v1214_v7 = vrot.slane %v1213_v9, 4  ;;  %v1356_v13 = vsel %vm3050_vm3, %v1354_v59, %v1355_v10  ;;  %v1357_v35 = vrot.slane %v1355_v10, 4  ;;  %v1393_v18 = vadd.bf16 %v1353_v23, %v1294_v2 }
 0x125   : > { %547 = vst [vmem:[#allocation2 + $0xb0] sm:$0xff] %v2225_v33  ;;  %v3059_v19 = vpack.c.bf16 %v490_v41, %v488_v50  ;;  %v1224_v5 = vrot.slane %v1223_v42, 4  ;;  %v1444_v27 = vrot.slane %v1443_v3, 4  ;;  %v1445_v28 = vrot.slane %v1420_v26, 5 }
 0x126   : > { %v1219_v38 = vsel %vm3019_vm0, %v1214_v7, %v1218_v1  ;;  %v1359_v51 = vsel %vm3050_vm3, %v1357_v35, %v2926_v46  ;;  %v1483_v40 = vadd.bf16 %v1443_v3, %v1393_v18  ;;  %v1520_v36 = vmul.bf16 %v3005_v21, %v2895_v20 }
 0x127   : > { %v713_v60 = vpop.f32.mrb[16].mxu0  ;;  %v1295_v58 = vadd.bf16 %v1219_v38, %v1173_v22  ;;  %v1296_v23 = vadd.bf16 %v1224_v5, %v1174_v30  ;;  %v1446_v33 = vsel %vm3050_vm3, %v1444_v27, %v1445_v28  ;;  %v1447_v41 = vrot.slane %v1445_v28, 4 }
 0x128   : > { %v714_v26 = vadd.f32 %v713_v60, %v2867_v0  ;;  %v715_v59 = vpop.f32.mrb[17].mxu0  ;;  %v1521_v1 = vmul.bf16 %v3009_v39, %v2895_v20  ;;  %v1544_v50 = vrot.slane %v1520_v36, 5  ;;  %v793_v46 = vmul.bf16 %v2973_v34, %v2842_v47 }
 0x129   : > { %v716_v29 = vadd.f32 %v715_v59, %v2872_v4  ;;  %v717_v9 = vpop.f32.mrb[18].mxu0  ;;  %v1394_v2 = vadd.bf16 %v1356_v13, %v1295_v58  ;;  %v1395_v22 = vadd.bf16 %v1359_v51, %v1296_v23  ;;  %v1449_v30 = vsel %vm3050_vm3, %v1447_v41, %v2928_v48 }
 0x12a   : > { %v723_v10 = vmul.f32 %v2933_v53, %v714_v26  ;;  %v718_v42 = vadd.f32 %v717_v9, %v2867_v0  ;;  %v719_v3 = vpop.f32.mrb[19].mxu0  ;;  %v1545_v7 = vrot.slane %v1544_v50, 4  ;;  %v1546_v35 = vrot.slane %v1521_v1, 5 }
 0x12b   : > { %v724_v18 = vmul.f32 %v2933_v53, %v716_v29  ;;  %v720_v5 = vadd.f32 %v719_v3, %v2872_v4  ;;  %v1484_v27 = vadd.bf16 %v1446_v33, %v1394_v2  ;;  %v1485_v28 = vadd.bf16 %v1449_v30, %v1395_v22 }
 0x12c   : > { %v725_v13 = vmul.f32 %v2933_v53, %v718_v42  ;;  %v1547_v38 = vsel %vm3050_vm3, %v1545_v7, %v1546_v35  ;;  %v1548_v51 = vrot.slane %v1546_v35, 4  ;;  %v3086_v48 = vadd.bf16 %v1544_v50, %v1483_v40 }
 0x12d   : > { %v2229_v36 = vpack.c.bf16 %v724_v18, %v723_v10  ;;  %v726_v0 = vmul.f32 %v2933_v53, %v720_v5  ;;  %v3089_v60 = vadd.bf16 %v1547_v38, %v1484_v27  ;;  %v3467_v58 = vmul.bf16 %v2961_v25, %v2842_v47 }
 0x12e   : > { %v1550_v23 = vsel %vm3050_vm3, %v1548_v51, %v2935_v54  ;;  %v1596_v33 = vmul.bf16 %v3086_v48, %v3086_v48  ;;  %v848_v40 = vadd.bf16 %v2853_v55, %v793_v46  ;;  %v879_v41 = vmul.bf16 %v3005_v21, %v2855_v56 }
 0x12f   : > { %v847_v4 = vadd.bf16 %v2853_v55, %v3467_v58  ;;  %740 = vst [vmem:[#allocation2 + $0xd8] sm:$0xff] %v2229_v36  ;;  %v2230_v53 = vpack.c.bf16 %v726_v0, %v725_v13  ;;  %v3103_v26 = vadd.bf16 %v1550_v23, %v1485_v28  ;;  %v1597_v59 = vmul.bf16 %v3089_v60, %v3089_v60 }
 0x130   : > { %v880_v1 = vmul.bf16 %v3009_v39, %v2855_v56  ;;  %v1608_v54 = vmul.bf16 %v1596_v33, %v3086_v48  ;;  %v917_v29 = vmul.bf16 %v3027_v6, %v2880_v8  ;;  %v918_v46 = vmul.bf16 %v3034_v12, %v2880_v8 }
 0x131   : > { %v891_v50 = vadd.bf16 %v879_v41, %v847_v4  ;;  %741 = vst [vmem:[#allocation2 + $0xe0] sm:$0xff] %v2230_v53  ;;  %v1598_v9 = vmul.bf16 %v3103_v26, %v3103_v26  ;;  %v1609_v2 = vmul.bf16 %v1597_v59, %v3089_v60  ;;  %v954_v30 = vmul.bf16 %v2973_v34, %v2920_v43 }
 0x132   : > { %v892_v22 = vadd.bf16 %v880_v1, %v848_v40  ;;  %v1620_v10 = vmul.bf16 1027030327, %v1608_v54  ;;  %v982_v3 = vshll.u32 %v2985_v49, 16  ;;  %v985_v7 = vshrl.u32 %v2985_v49, 16 }
 0x133   : > { %v929_v42 = vadd.bf16 %v917_v29, %v891_v50  ;;  %v1610_v35 = vmul.bf16 %v1598_v9, %v3103_v26  ;;  %v1621_v18 = vmul.bf16 1027030327, %v1609_v2  ;;  %v991_v27 = vshll.u32 %v954_v30, 16 }
 0x134   : > { %v930_v5 = vadd.bf16 %v918_v46, %v892_v22  ;;  %v1632_v28 = vadd.bf16 %v1620_v10, %v3086_v48  ;;  %v984_v13 = vrot.slane %v982_v3, 5  ;;  %v987_v38 = vrot.slane %v985_v7, 4 }
 0x135   : > { %v995_v51 = vshrl.u32 %v954_v30, 16  ;;  %v1622_v36 = vmul.bf16 1027030327, %v1610_v35  ;;  %v1633_v0 = vadd.bf16 %v1621_v18, %v3089_v60  ;;  %v993_v58 = vrot.slane %v991_v27, 5 }
 0x136   : > { %v1078_v4 = vmul.bf16 %v3005_v21, %v2922_v44  ;;  %v1644_v23 = vmul.bf16 1061961548, %v1632_v28  ;;  %v988_v33 = vor.u32 %v987_v38, %v984_v13  ;;  %v1053_v40 = vadd.bf16 %v984_v13, %v2937_v57 }
 0x137   : > { %v997_v49 = vrot.slane %v995_v51, 4  ;;  %v1634_v41 = vadd.bf16 %v1622_v36, %v3103_v26  ;;  %v1645_v53 = vmul.bf16 1061961548, %v1633_v0  ;;  %v1079_v59 = vmul.bf16 %v3009_v39, %v2922_v44 }
 0x138   : > { %v1104_v1 = vshll.u32 %v1078_v4, 16  ;;  %2390 = vtanh.bf16 %v1644_v23  ;;  %v989_v54 = vrot.slane %v988_v33, 4  ;;  %v1107_v29 = vshrl.u32 %v1078_v4, 16 }
 0x139   : > { %v998_v50 = vor.u32 %v997_v49, %v993_v58  ;;  %v1646_v46 = vmul.bf16 1061961548, %v1634_v41  ;;  %2392 = vtanh.bf16 %v1645_v53  ;;  %v1113_v2 = vshll.u32 %v1079_v59, 16 }
 0x13a   : > { %v1106_v9 = vrot.slane %v1104_v1, 5  ;;  %v994_v22 = vsel %vm3019_vm0, %v989_v54, %v993_v58  ;;  %v1109_v57 = vrot.slane %v1107_v29, 4  ;;  %v1117_v10 = vshrl.u32 %v1079_v59, 16 }
 0x13b   : > { %v999_v30 = vrot.slane %v998_v50, 4  ;;  %2394 = vtanh.bf16 %v1646_v46  ;;  %v1054_v3 = vadd.bf16 %v994_v22, %v929_v42  ;;  %v1115_v7 = vrot.slane %v1113_v2, 5 }
 0x13c   : > { %v1175_v35 = vadd.bf16 %v1106_v9, %v1053_v40  ;;  %v1110_v27 = vor.u32 %v1109_v57, %v1106_v9  ;;  %v1119_v28 = vrot.slane %v1117_v10, 4  ;;  %v1200_v13 = vmul.bf16 %v3027_v6, %v2924_v45 }
 0x13d   : > { %v1055_v18 = vadd.bf16 %v999_v30, %v930_v5  ;;  %v1201_v38 = vmul.bf16 %v3034_v12, %v2924_v45  ;;  %v1329_v51 = vmul.bf16 %v2961_v25, %v2889_v15  ;;  %v1330_v36 = vmul.bf16 %v2973_v34, %v2889_v15 }
 0x13e   : > { %v1422_v42 = vmul.bf16 %v3005_v21, %v2891_v16  ;;  %v1111_v0 = vrot.slane %v1110_v27, 4  ;;  %v1120_v58 = vor.u32 %v1119_v28, %v1115_v7  ;;  %v1226_v5 = vshll.u32 %v1200_v13, 16 }
 0x13f   : > { %v1229_v4 = vshrl.u32 %v1200_v13, 16  ;;  %v1235_v23 = vshll.u32 %v1201_v38, 16  ;;  %v1239_v33 = vshrl.u32 %v1201_v38, 16  ;;  %v1360_v49 = vrot.slane %v1329_v51, 5 }
 0x140   : > { %v1362_v40 = vrot.slane %v1330_v36, 5  ;;  %v1116_v41 = vsel %vm3019_vm0, %v1111_v0, %v1115_v7  ;;  %v1121_v53 = vrot.slane %v1120_v58, 4  ;;  %v1228_v59 = vrot.slane %v1226_v5, 5 }
 0x141   : > { %v1231_v25 = vrot.slane %v1229_v4, 4  ;;  %v1176_v1 = vadd.bf16 %v1116_v41, %v1054_v3  ;;  %v1237_v54 = vrot.slane %v1235_v23, 5  ;;  %v1241_v34 = vrot.slane %v1239_v33, 4 }
 0x142   : > { %v1361_v50 = vrot.slane %v1360_v49, 4  ;;  %v1177_v29 = vadd.bf16 %v1121_v53, %v1055_v18  ;;  %v1297_v9 = vadd.bf16 %v1228_v59, %v1175_v35  ;;  %v1364_v2 = vrot.slane %v1362_v40, 4 }
 0x143   : > { %v1232_v46 = vor.u32 %v1231_v25, %v1228_v59  ;;  %v2391_v22 = vpop.eup %2390  ;;  %v1242_v30 = vor.u32 %v1241_v34, %v1237_v54  ;;  %v1423_v10 = vmul.bf16 %v3009_v39, %v2891_v16  ;;  %v1450_v7 = vrot.slane %v1422_v42, 5 }
 0x144   : > { %v1363_v57 = vsel %vm3050_vm3, %v1361_v50, %v1362_v40  ;;  %v2393_v27 = vpop.eup %2392  ;;  %v1668_v28 = vadd.bf16 1065369472, %v2391_v22  ;;  %v1366_v18 = vsel %vm3050_vm3, %v1364_v2, %v2941_v61  ;;  %v1396_v13 = vadd.bf16 %v1360_v49, %v1297_v9 }
 0x145   : > { %v1233_v3 = vrot.slane %v1232_v46, 4  ;;  %v1669_v35 = vadd.bf16 1065369472, %v2393_v27  ;;  %v1243_v38 = vrot.slane %v1242_v30, 4  ;;  %v1451_v51 = vrot.slane %v1450_v7, 4 }
 0x146   : > { %v1452_v36 = vrot.slane %v1423_v10, 5  ;;  %v2395_v0 = vpop.eup %2394  ;;  %v1680_v58 = vmul.bf16 1056980736, %v1668_v28  ;;  %v1486_v4 = vadd.bf16 %v1450_v7, %v1396_v13  ;;  %v1523_v42 = vmul.bf16 %v3027_v6, %v2895_v20 }
 0x147   : > { %v1238_v5 = vsel %vm3019_vm0, %v1233_v3, %v1237_v54  ;;  %v1670_v23 = vadd.bf16 1065369472, %v2395_v0  ;;  %v1681_v33 = vmul.bf16 1056980736, %v1669_v35  ;;  %v1299_v41 = vadd.bf16 %v1243_v38, %v1177_v29 }
 0x148   : > { %v1298_v40 = vadd.bf16 %v1238_v5, %v1176_v1  ;;  %v1692_v61 = vmul.bf16 %v1680_v58, %v3086_v48  ;;  %v1453_v49 = vsel %vm3050_vm3, %v1451_v51, %v1452_v36  ;;  %v1454_v53 = vrot.slane %v1452_v36, 4  ;;  %v3184_v5 = vld [vmem:[#allocation2 + $0xb0] sm:$0xff] }
 0x149   : > { %v1524_v59 = vmul.bf16 %v3034_v12, %v2895_v20  ;;  %v1682_v25 = vmul.bf16 1056980736, %v1670_v23  ;;  %v1693_v54 = vmul.bf16 %v1681_v33, %v3089_v60  ;;  %v1398_v50 = vadd.bf16 %v1366_v18, %v1299_v41 }
 0x14a   : > { %v1397_v34 = vadd.bf16 %v1363_v57, %v1298_v40  ;;  %v1707_v46 = vshrl.u32 %v1692_v61, 16  ;;  %v1456_v1 = vsel %vm3050_vm3, %v1454_v53, %v2943_v62  ;;  %v1551_v29 = vrot.slane %v1523_v42, 5 }
 0x14b   : > { %v1553_v9 = vrot.slane %v1524_v59, 5  ;;  %v1694_v48 = vmul.bf16 %v1682_v25, %v3103_v26  ;;  %v1712_v2 = vshrl.u32 %v1693_v54, 16  ;;  %v1715_v22 = vshll.u32 %v1693_v54, 16 }
 0x14c   : > { %v1487_v30 = vadd.bf16 %v1453_v49, %v1397_v34  ;;  %v2183_v10 = vrot.slane %v1707_v46, 11  ;;  %v1488_v7 = vadd.bf16 %v1456_v1, %v1398_v50  ;;  %v1552_v27 = vrot.slane %v1551_v29, 4 }
 0x14d   : > { %v1555_v28 = vrot.slane %v1553_v9, 4  ;;  %v1714_v3 = vrot.slane %v1712_v2, 7  ;;  %v1721_v60 = vshrl.u32 %v1694_v48, 16  ;;  %v1724_v57 = vshll.u32 %v1694_v48, 16 }
 0x14e   : > { %v3165_v18 = vadd.bf16 %v1551_v29, %v1486_v4  ;;  %v1554_v26 = vsel %vm3050_vm3, %v1552_v27, %v1553_v9  ;;  %v795_v35 = vmul.bf16 %v3005_v21, %v2842_v47  ;;  %v796_v38 = vmul.bf16 %v3009_v39, %v2842_v47 }
 0x14f   : > { %v1557_v13 = vsel %vm3050_vm3, %v1555_v28, %v2953_v14  ;;  %v1717_v51 = vor.u32 %v1715_v22, %v1714_v3  ;;  %v1719_v36 = vrot.slane %v1714_v3, 4  ;;  %v1723_v0 = vrot.slane %v1721_v60, 7 }
 0x150   : > { %v3182_v58 = vadd.bf16 %v1554_v26, %v1487_v30  ;;  %v3186_v4 = vadd.bf16 %v1557_v13, %v1488_v7  ;;  %v1599_v42 = vmul.bf16 %v3165_v18, %v3165_v18  ;;  %v850_v14 = vadd.bf16 %v2853_v55, %v795_v35 }
 0x151   : > { %v851_v23 = vadd.bf16 %v2853_v55, %v796_v38  ;;  %v1718_v33 = vsel %vm3169_vm5, %v2183_v10, %v1717_v51  ;;  %v1726_v40 = vor.u32 %v1724_v57, %v1723_v0  ;;  %v882_v61 = vmul.bf16 %v3027_v6, %v2855_v56 }
 0x152   : > { %v1600_v41 = vmul.bf16 %v3182_v58, %v3182_v58  ;;  %v1601_v49 = vmul.bf16 %v3186_v4, %v3186_v4  ;;  %v1611_v53 = vmul.bf16 %v1599_v42, %v3165_v18  ;;  %v883_v59 = vmul.bf16 %v3034_v12, %v2855_v56 }
 0x153   : > { %v920_v25 = vmul.bf16 %v2880_v8, %v3184_v5  ;;  %v1727_v54 = vsel %vm3169_vm5, %v1719_v36, %v1726_v40  ;;  %v894_v50 = vadd.bf16 %v882_v61, %v850_v14  ;;  %v921_v46 = vmul.bf16 %v3059_v19, %v2880_v8 }
 0x154   : > { %v1612_v34 = vmul.bf16 %v1600_v41, %v3182_v58  ;;  %v2188_v1 = vcombine.low %v1718_v33, %v1727_v54  ;;  %v2189_v29 = vcombine.high %v1718_v33, %v1727_v54  ;;  %v1613_v9 = vmul.bf16 %v1601_v49, %v3186_v4 }
 0x155   : > { %v1623_v48 = vmul.bf16 1027030327, %v1611_v53  ;;  %v895_v22 = vadd.bf16 %v883_v59, %v851_v23  ;;  %v932_v30 = vadd.bf16 %v920_v25, %v894_v50  ;;  %v955_v10 = vmul.bf16 %v3005_v21, %v2920_v43 }
 0x156   : > { %v1624_v2 = vmul.bf16 1027030327, %v1612_v34  ;;  %1993 = vmatprep.mubr.bf16.mxu1 %v2189_v29  ;;  %v1625_v7 = vmul.bf16 1027030327, %v1613_v9  ;;  %v956_v28 = vmul.bf16 %v3009_v39, %v2920_v43  ;;  %v1080_v3 = vmul.bf16 %v3027_v6, %v2922_v44 }
 0x157   : > { %v1635_v27 = vadd.bf16 %v1623_v48, %v3165_v18  ;;  %1994 = vmatmul.mubr.bf16.vlgmr.msra.gmra.mrb[4].mxu1 %v2188_v1  ;;  %v933_v57 = vadd.bf16 %v921_v46, %v895_v22  ;;  %v1001_v26 = vshll.u32 %v955_v10, 16  ;;  %v1004_v13 = vshrl.u32 %v955_v10, 16 }
 0x158   : > { %v1636_v60 = vadd.bf16 %v1624_v2, %v3182_v58  ;;  %v1637_v35 = vadd.bf16 %v1625_v7, %v3186_v4  ;;  %v1010_v51 = vshll.u32 %v956_v28, 16  ;;  %v1014_v36 = vshrl.u32 %v956_v28, 16 }
 0x159   : > { %v1647_v38 = vmul.bf16 1061961548, %v1635_v27  ;;  %v1003_v42 = vrot.slane %v1001_v26, 5  ;;  %v1006_v14 = vrot.slane %v1004_v13, 4  ;;  %v1081_v23 = vmul.bf16 %v3034_v12, %v2922_v44 }
 0x15a   : > { %v1648_v0 = vmul.bf16 1061961548, %v1636_v60  ;;  %v1649_v33 = vmul.bf16 1061961548, %v1637_v35  ;;  %v1012_v40 = vrot.slane %v1010_v51, 5  ;;  %v1016_v41 = vrot.slane %v1014_v36, 4 }
 0x15b   : > { %2396 = vtanh.bf16 %v1647_v38  ;;  %v1007_v61 = vor.u32 %v1006_v14, %v1003_v42  ;;  %v1056_v49 = vadd.bf16 %v1003_v42, %v2945_v63  ;;  %v1123_v53 = vshll.u32 %v1080_v3, 16 }
 0x15c   : > { %2398 = vtanh.bf16 %v1648_v0  ;;  %v1017_v59 = vor.u32 %v1016_v41, %v1012_v40  ;;  %v1126_v25 = vshrl.u32 %v1080_v3, 16  ;;  %v1132_v54 = vshll.u32 %v1081_v23, 16 }
 0x15d   : > { %2400 = vtanh.bf16 %v1649_v33  ;;  %v1008_v34 = vrot.slane %v1007_v61, 4  ;;  %v1125_v50 = vrot.slane %v1123_v53, 5  ;;  %v1136_v46 = vshrl.u32 %v1081_v23, 16 }
 0x15e   : > { %v1202_v1 = vmul.bf16 %v2924_v45, %v3184_v5  ;;  %v1018_v29 = vrot.slane %v1017_v59, 4  ;;  %v1128_v9 = vrot.slane %v1126_v25, 4  ;;  %v1134_v48 = vrot.slane %v1132_v54, 5 }
 0x15f   : > { %v1203_v2 = vmul.bf16 %v3059_v19, %v2924_v45  ;;  %v1013_v63 = vsel %vm3019_vm0, %v1008_v34, %v1012_v40  ;;  %v1138_v22 = vrot.slane %v1136_v46, 4  ;;  %v1178_v10 = vadd.bf16 %v1125_v50, %v1056_v49 }
 0x160   : > { %v1245_v7 = vshll.u32 %v1202_v1, 16  ;;  %v1057_v27 = vadd.bf16 %v1013_v63, %v932_v30  ;;  %v1058_v28 = vadd.bf16 %v1018_v29, %v933_v57  ;;  %v1129_v3 = vor.u32 %v1128_v9, %v1125_v50 }
 0x161   : > { %v1248_v60 = vshrl.u32 %v1202_v1, 16  ;;  %v1139_v26 = vor.u32 %v1138_v22, %v1134_v48  ;;  %v1254_v35 = vshll.u32 %v1203_v2, 16  ;;  %v1258_v38 = vshrl.u32 %v1203_v2, 16 }
 0x162   : > { %v1247_v13 = vrot.slane %v1245_v7, 5  ;;  %v1130_v51 = vrot.slane %v1129_v3, 4  ;;  %v1332_v0 = vmul.bf16 %v3005_v21, %v2889_v15  ;;  %v1333_v42 = vmul.bf16 %v3009_v39, %v2889_v15 }
 0x163   : > { %v1250_v36 = vrot.slane %v1248_v60, 4  ;;  %v1140_v14 = vrot.slane %v1139_v26, 4  ;;  %v1256_v23 = vrot.slane %v1254_v35, 5  ;;  %v1260_v33 = vrot.slane %v1258_v38, 4 }
 0x164   : > { %v1300_v40 = vadd.bf16 %v1247_v13, %v1178_v10  ;;  %v1135_v30 = vsel %vm3019_vm0, %v1130_v51, %v1134_v48  ;;  %v1367_v41 = vrot.slane %v1332_v0, 5  ;;  %v1369_v61 = vrot.slane %v1333_v42, 5 }
 0x165   : > { %v1251_v57 = vor.u32 %v1250_v36, %v1247_v13  ;;  %v1179_v53 = vadd.bf16 %v1135_v30, %v1057_v27  ;;  %v1180_v59 = vadd.bf16 %v1140_v14, %v1058_v28  ;;  %v1261_v25 = vor.u32 %v1260_v33, %v1256_v23 }
 0x166   : > { %v2397_v49 = vpop.eup %2396  ;;  %v1425_v21 = vmul.bf16 %v3027_v6, %v2891_v16  ;;  %v1368_v50 = vrot.slane %v1367_v41, 4  ;;  %v1371_v46 = vrot.slane %v1369_v61, 4  ;;  %v1399_v2 = vadd.bf16 %v1367_v41, %v1300_v40 }
 0x167   : > { %v2399_v54 = vpop.eup %2398  ;;  %v1671_v34 = vadd.bf16 1065369472, %v2397_v49  ;;  %v1252_v39 = vrot.slane %v1251_v57, 4  ;;  %v1262_v9 = vrot.slane %v1261_v25, 4  ;;  %v1426_v48 = vmul.bf16 %v3034_v12, %v2891_v16 }
 0x168   : > { %v2401_v1 = vpop.eup %2400  ;;  %v1672_v29 = vadd.bf16 1065369472, %v2399_v54  ;;  %v1370_v7 = vsel %vm3050_vm3, %v1368_v50, %v1369_v61  ;;  %v1373_v60 = vsel %vm3050_vm3, %v1371_v46, %v2955_v17  ;;  %v1457_v35 = vrot.slane %v1425_v21, 5 }
 0x169   : > { %v1673_v63 = vadd.bf16 1065369472, %v2401_v1  ;;  %v1683_v22 = vmul.bf16 1056980736, %v1671_v34  ;;  %v1257_v10 = vsel %vm3019_vm0, %v1252_v39, %v1256_v23  ;;  %v1302_v3 = vadd.bf16 %v1262_v9, %v1180_v59 }
 0x16a   : > { %v1684_v27 = vmul.bf16 1056980736, %v1672_v29  ;;  %v1301_v28 = vadd.bf16 %v1257_v10, %v1179_v53  ;;  %v1459_v38 = vrot.slane %v1426_v48, 5  ;;  %v1526_v42 = vmul.bf16 %v2895_v20, %v3184_v5 }
 0x16b   : > { %v1685_v26 = vmul.bf16 1056980736, %v1673_v63  ;;  %v1695_v13 = vmul.bf16 %v1683_v22, %v3165_v18  ;;  %v1401_v0 = vadd.bf16 %v1373_v60, %v1302_v3  ;;  %v1458_v33 = vrot.slane %v1457_v35, 4 }
 0x16c   : > { %v1696_v51 = vmul.bf16 %v1684_v27, %v3182_v58  ;;  %v1400_v36 = vadd.bf16 %v1370_v7, %v1301_v28  ;;  %v1461_v40 = vrot.slane %v1459_v38, 4  ;;  %v1489_v17 = vadd.bf16 %v1457_v35, %v1399_v2  ;;  %v3275_v27 = vld [vmem:[#allocation2 + $0xd8] sm:$0xff] }
 0x16d   : > { %v1697_v14 = vmul.bf16 %v1685_v26, %v3186_v4  ;;  %v1729_v23 = vshrl.u32 %v1695_v13, 16  ;;  %v1527_v18 = vmul.bf16 %v3059_v19, %v2895_v20  ;;  %v1460_v58 = vsel %vm3050_vm3, %v1458_v33, %v1459_v38 }
 0x16e   : > { %v1734_v30 = vshrl.u32 %v1696_v51, 16  ;;  %v1737_v57 = vshll.u32 %v1696_v51, 16  ;;  %v1463_v4 = vsel %vm3050_vm3, %v1461_v40, %v2959_v24  ;;  %v1490_v59 = vadd.bf16 %v1460_v58, %v1400_v36  ;;  %v3290_v51 = vld [vmem:[#allocation2 + $0xe0] sm:$0xff] }
 0x16f   : > { %v2184_v41 = vrot.slane %v1729_v23, 11  ;;  %v1743_v61 = vshrl.u32 %v1697_v14, 16  ;;  %v1746_v49 = vshll.u32 %v1697_v14, 16  ;;  %v1558_v25 = vrot.slane %v1526_v42, 5 }
 0x170   : > { %v1736_v53 = vrot.slane %v1734_v30, 7  ;;  %v1491_v54 = vadd.bf16 %v1463_v4, %v1401_v0  ;;  %v1560_v34 = vrot.slane %v1527_v18, 5  ;;  %v798_v39 = vmul.bf16 %v3027_v6, %v2842_v47 }
 0x171   : > { %v1745_v21 = vrot.slane %v1743_v61, 7  ;;  %v1559_v1 = vrot.slane %v1558_v25, 4  ;;  %v3260_v29 = vadd.bf16 %v1558_v25, %v1489_v17  ;;  %v799_v48 = vmul.bf16 %v3034_v12, %v2842_v47 }
 0x172   : > { %v1739_v50 = vor.u32 %v1737_v57, %v1736_v53  ;;  %v1741_v46 = vrot.slane %v1736_v53, 4  ;;  %v1562_v2 = vrot.slane %v1560_v34, 4  ;;  %v3470_v24 = vmul.bf16 %v2889_v15, %v2911_v37 }
 0x173   : > { %v1748_v9 = vor.u32 %v1746_v49, %v1745_v21  ;;  %v1561_v10 = vsel %vm3050_vm3, %v1559_v1, %v1560_v34  ;;  %v1602_v7 = vmul.bf16 %v3260_v29, %v3260_v29  ;;  %v885_v28 = vmul.bf16 %v2855_v56, %v3184_v5 }
 0x174   : > { %v3267_v63 = vrot.slane %v3470_v24, 5  ;;  %v1740_v22 = vsel %vm3169_vm5, %v2184_v41, %v1739_v50  ;;  %v1564_v37 = vsel %vm3050_vm3, %v1562_v2, %v2965_v31  ;;  %v3284_v3 = vadd.bf16 %v1561_v10, %v1490_v59 }
 0x175   : > { %v1749_v47 = vsel %vm3169_vm5, %v1741_v46, %v1748_v9  ;;  %v853_v60 = vadd.bf16 %v2853_v55, %v798_v39  ;;  %v3287_v35 = vadd.bf16 %v1564_v37, %v1491_v54  ;;  %v1614_v38 = vmul.bf16 %v1602_v7, %v3260_v29 }
 0x176   : > { %v2191_v26 = vcombine.high %v1740_v22, %v1749_v47  ;;  %v2190_v13 = vcombine.low %v1740_v22, %v1749_v47  ;;  %v1603_v36 = vmul.bf16 %v3284_v3, %v3284_v3  ;;  %v854_v0 = vadd.bf16 %v2853_v55, %v799_v48 }
 0x177   : > { %v886_v31 = vmul.bf16 %v3059_v19, %v2855_v56  ;;  %v923_v42 = vmul.bf16 %v2880_v8, %v3275_v27  ;;  %v1604_v14 = vmul.bf16 %v3287_v35, %v3287_v35  ;;  %v1626_v23 = vmul.bf16 1027030327, %v1614_v38 }
 0x178   : > { %2001 = vmatprep.mubr.bf16.mxu1 %v2191_v26  ;;  %v897_v33 = vadd.bf16 %v885_v28, %v853_v60  ;;  %v957_v40 = vmul.bf16 %v3027_v6, %v2920_v43  ;;  %v1615_v30 = vmul.bf16 %v1603_v36, %v3284_v3  ;;  %v924_v55 = vmul.bf16 %v2880_v8, %v3290_v51 }
 0x179   : > { %2002 = vmatmul.mubr.bf16.gmra.mrb[8].mxu1 %v2190_v13  ;;  %v898_v57 = vadd.bf16 %v886_v31, %v854_v0  ;;  %v958_v56 = vmul.bf16 %v3034_v12, %v2920_v43  ;;  %v1616_v17 = vmul.bf16 %v1604_v14, %v3287_v35  ;;  %v1638_v18 = vadd.bf16 %v1626_v23, %v3260_v29 }
 0x17a   : > { %v1020_v41 = vshll.u32 %v957_v40, 16  ;;  %v1023_v61 = vshrl.u32 %v957_v40, 16  ;;  %v1627_v49 = vmul.bf16 1027030327, %v1615_v30  ;;  %v935_v58 = vadd.bf16 %v923_v42, %v897_v33 }
 0x17b   : > { %v1029_v53 = vshll.u32 %v958_v56, 16  ;;  %v1033_v4 = vshrl.u32 %v958_v56, 16  ;;  %v1628_v59 = vmul.bf16 1027030327, %v1616_v17  ;;  %v1650_v25 = vmul.bf16 1061961548, %v1638_v18 }
 0x17c   : > { %v1022_v21 = vrot.slane %v1020_v41, 5  ;;  %v1025_v54 = vrot.slane %v1023_v61, 4  ;;  %v1639_v34 = vadd.bf16 %v1627_v49, %v3284_v3  ;;  %v1082_v43 = vmul.bf16 %v2922_v44, %v3184_v5 }
 0x17d   : > { %v1031_v8 = vrot.slane %v1029_v53, 5  ;;  %v1035_v39 = vrot.slane %v1033_v4, 4  ;;  %v1640_v50 = vadd.bf16 %v1628_v59, %v3287_v35  ;;  %2402 = vtanh.bf16 %v1650_v25 }
 0x17e   : > { %v936_v46 = vadd.bf16 %v924_v55, %v898_v57  ;;  %v1026_v1 = vor.u32 %v1025_v54, %v1022_v21  ;;  %v1651_v9 = vmul.bf16 1061961548, %v1639_v34  ;;  %v1083_v48 = vmul.bf16 %v3059_v19, %v2922_v44 }
 0x17f   : > { %v1036_v2 = vor.u32 %v1035_v39, %v1031_v8  ;;  %v1142_v24 = vshll.u32 %v1082_v43, 16  ;;  %v1652_v22 = vmul.bf16 1061961548, %v1640_v50  ;;  %v1145_v7 = vshrl.u32 %v1082_v43, 16 }
 0x180   : > { %v1027_v10 = vrot.slane %v1026_v1, 4  ;;  %v1204_v28 = vmul.bf16 %v2924_v45, %v3275_v27  ;;  %2404 = vtanh.bf16 %v1651_v9  ;;  %v1151_v60 = vshll.u32 %v1083_v48, 16 }
 0x181   : > { %v1037_v47 = vrot.slane %v1036_v2, 4  ;;  %v1144_v37 = vrot.slane %v1142_v24, 5  ;;  %2406 = vtanh.bf16 %v1652_v22  ;;  %v1147_v13 = vrot.slane %v1145_v7, 4 }
 0x182   : > { %v1032_v26 = vsel %vm3019_vm0, %v1027_v10, %v1031_v8  ;;  %v1155_v38 = vshrl.u32 %v1083_v48, 16  ;;  %v1059_v36 = vadd.bf16 %v1022_v21, %v2967_v32  ;;  %v1153_v31 = vrot.slane %v1151_v60, 5  ;;  %v2414_v48 = vld [vmem:[#allocation2 + $0xc0] sm:$0x11] }
 0x183   : > { %v1060_v44 = vadd.bf16 %v1032_v26, %v935_v58  ;;  %v1061_v0 = vadd.bf16 %v1037_v47, %v936_v46  ;;  %v1148_v42 = vor.u32 %v1147_v13, %v1144_v37  ;;  %v1205_v23 = vmul.bf16 %v2924_v45, %v3290_v51 }
 0x184   : > { %v1157_v14 = vrot.slane %v1155_v38, 4  ;;  %v1264_v33 = vshll.u32 %v1204_v28, 16  ;;  %v1181_v40 = vadd.bf16 %v1144_v37, %v1059_v36  ;;  %v1267_v30 = vshrl.u32 %v1204_v28, 16 }
 0x185   : > { %v1335_v57 = vmul.bf16 %v3027_v6, %v2889_v15  ;;  %v1336_v55 = vmul.bf16 %v3034_v12, %v2889_v15  ;;  %v1149_v56 = vrot.slane %v1148_v42, 4  ;;  %v1273_v18 = vshll.u32 %v1205_v23, 16 }
 0x186   : > { %v1158_v17 = vor.u32 %v1157_v14, %v1153_v31  ;;  %v1266_v32 = vrot.slane %v1264_v33, 5  ;;  %v1269_v41 = vrot.slane %v1267_v30, 4  ;;  %v1277_v61 = vshrl.u32 %v1205_v23, 16  ;;  %v1311_v23 = vld [vmem:[#allocation2 + $0xe8] sm:$0x11] }
 0x187   : > { %v1374_v49 = vrot.slane %v1335_v57, 5  ;;  %v1376_v58 = vrot.slane %v1336_v55, 5  ;;  %v1275_v4 = vrot.slane %v1273_v18, 5  ;;  %v1428_v59 = vmul.bf16 %v2891_v16, %v3184_v5 }
 0x188   : > { %v1159_v53 = vrot.slane %v1158_v17, 4  ;;  %v1303_v45 = vadd.bf16 %v1266_v32, %v1181_v40  ;;  %v2403_v25 = vpop.eup %2402  ;;  %v1154_v6 = vsel %vm3019_vm0, %v1149_v56, %v1153_v31  ;;  %v1270_v21 = vor.u32 %v1269_v41, %v1266_v32 }
 0x189   : > { %v1279_v15 = vrot.slane %v1277_v61, 4  ;;  %v1375_v12 = vrot.slane %v1374_v49, 4  ;;  %v1674_v54 = vadd.bf16 1065369472, %v2403_v25  ;;  %v1182_v34 = vadd.bf16 %v1154_v6, %v1060_v44 }
 0x18a   : > { %v1183_v8 = vadd.bf16 %v1159_v53, %v1061_v0  ;;  %v1378_v39 = vrot.slane %v1376_v58, 4  ;;  %v1271_v43 = vrot.slane %v1270_v21, 4  ;;  %v1402_v46 = vadd.bf16 %v1374_v49, %v1303_v45 }
 0x18b   : > { %v1280_v50 = vor.u32 %v1279_v15, %v1275_v4  ;;  %v1429_v1 = vmul.bf16 %v3059_v19, %v2891_v16  ;;  %v2405_v9 = vpop.eup %2404  ;;  %v1686_v2 = vmul.bf16 1056980736, %v1674_v54  ;;  %v1377_v5 = vsel %vm3050_vm3, %v1375_v12, %v1376_v58 }
 0x18c   : > { %v1430_v24 = vmul.bf16 %v2414_v48, %v2891_v16  ;;  %v1464_v22 = vrot.slane %v1428_v59, 5  ;;  %v2407_v10 = vpop.eup %2406  ;;  %v1675_v7 = vadd.bf16 1065369472, %v2405_v9  ;;  %v1276_v28 = vsel %vm3019_vm0, %v1271_v43, %v1275_v4 }
 0x18d   : > { %v1281_v47 = vrot.slane %v1280_v50, 4  ;;  %v1466_v37 = vrot.slane %v1429_v1, 5  ;;  %v1676_v60 = vadd.bf16 1065369472, %v2407_v10  ;;  %v1698_v26 = vmul.bf16 %v1686_v2, %v3260_v29 }
 0x18e   : > { %v1304_v19 = vadd.bf16 %v1276_v28, %v1182_v34  ;;  %v1465_v13 = vrot.slane %v1464_v22, 4  ;;  %v1687_v38 = vmul.bf16 1056980736, %v1675_v7  ;;  %v1469_v0 = vrot.slane %v1430_v24, 5 }
 0x18f   : > { %v1305_v36 = vadd.bf16 %v1281_v47, %v1183_v8  ;;  %v1468_v44 = vrot.slane %v1466_v37, 4  ;;  %v1688_v31 = vmul.bf16 1056980736, %v1676_v60  ;;  %v1380_v16 = vsel %vm3050_vm3, %v1378_v39, %v3267_v63 }
 0x190   : > { %v1403_v42 = vadd.bf16 %v1377_v5, %v1304_v19  ;;  %v1699_v52 = vmul.bf16 %v1687_v38, %v3284_v3  ;;  %v1751_v14 = vshrl.u32 %v1698_v26, 16  ;;  %v1467_v29 = vsel %vm3050_vm3, %v1465_v13, %v1466_v37 }
 0x191   : > { %v1404_v33 = vadd.bf16 %v1380_v16, %v1305_v36  ;;  %v1700_v40 = vmul.bf16 %v1688_v31, %v3287_v35  ;;  %v1492_v30 = vadd.bf16 %v1464_v22, %v1402_v46  ;;  %v1529_v57 = vmul.bf16 %v2895_v20, %v3275_v27 }
 0x192   : > { %v1756_v55 = vshrl.u32 %v1699_v52, 16  ;;  %v1470_v56 = vsel %vm3050_vm3, %v1468_v44, %v1469_v0  ;;  %v1493_v63 = vadd.bf16 %v1467_v29, %v1403_v42  ;;  %v1530_v3 = vmul.bf16 %v2895_v20, %v3290_v51 }
 0x193   : > { %v1759_v17 = vshll.u32 %v1699_v52, 16  ;;  %v1765_v32 = vshrl.u32 %v1700_v40, 16  ;;  %v1531_v18 = vmul.bf16 %v2895_v20, %v1311_v23  ;;  %v1565_v35 = vrot.slane %v1529_v57, 5 }
 0x194   : > { %v1758_v41 = vrot.slane %v1756_v55, 7  ;;  %v1768_v61 = vshll.u32 %v1700_v40, 16  ;;  %v1494_v49 = vadd.bf16 %v1470_v56, %v1404_v33  ;;  %v1567_v58 = vrot.slane %v1530_v3, 5 }
 0x195   : > { %v1767_v53 = vrot.slane %v1765_v32, 7  ;;  %v1566_v4 = vrot.slane %v1565_v35, 4  ;;  %v1570_v27 = vrot.slane %v1531_v18, 5  ;;  %v1593_v45 = vadd.bf16 %v1565_v35, %v1492_v30 }
 0x196   : > { %v2185_v59 = vrot.slane %v1751_v14, 11  ;;  %v1761_v25 = vor.u32 %v1759_v17, %v1758_v41  ;;  %v1763_v6 = vrot.slane %v1758_v41, 4  ;;  %v1569_v21 = vrot.slane %v1567_v58, 4 }
 0x197   : > { %v1770_v15 = vor.u32 %v1768_v61, %v1767_v53  ;;  %v1568_v51 = vsel %vm3050_vm3, %v1566_v4, %v1567_v58  ;;  %v1605_v12 = vmul.bf16 %v1593_v45, %v1593_v45  ;;  %v2187_v61 = vld [vmem:[%s3451_s6] ss:$0 sm:$0xff] }
 0x198   : > { %v1762_v20 = vsel %vm3169_vm5, %v2185_v59, %v1761_v25  ;;  %v1571_v54 = vsel %vm3050_vm3, %v1569_v21, %v1570_v27  ;;  %v1594_v34 = vadd.bf16 %v1568_v51, %v1493_v63 }
 0x199   : > { %v1771_v8 = vsel %vm3169_vm5, %v1763_v6, %v1770_v15  ;;  %v1595_v39 = vadd.bf16 %v1571_v54, %v1494_v49  ;;  %v1617_v43 = vmul.bf16 %v1605_v12, %v1593_v45 }
 0x19a   : > { %v2193_v50 = vcombine.high %v1762_v20, %v1771_v8  ;;  %v2192_v46 = vcombine.low %v1762_v20, %v1771_v8  ;;  %v1606_v1 = vmul.bf16 %v1594_v34, %v1594_v34 }
 0x19b   : > { %v1607_v9 = vmul.bf16 %v1595_v39, %v1595_v39  ;;  %v1629_v2 = vmul.bf16 1027030327, %v1617_v43 }
 0x19c   : > { %2009 = vmatprep.mubr.bf16.mxu1 %v2193_v50  ;;  %v1618_v5 = vmul.bf16 %v1606_v1, %v1594_v34 }
 0x19d   : > { %2010 = vmatmul.mubr.bf16.gmra.mrb[12].mxu1 %v2192_v46  ;;  %v1619_v48 = vmul.bf16 %v1607_v9, %v1595_v39  ;;  %v1641_v24 = vadd.bf16 %v1629_v2, %v1593_v45 }
 0x19e   : > { %v1630_v22 = vmul.bf16 1027030327, %v1618_v5 }
 0x19f   : > { %v1631_v10 = vmul.bf16 1027030327, %v1619_v48  ;;  %v1653_v11 = vmul.bf16 1061961548, %v1641_v24 }
 0x1a0   : > { %v1642_v7 = vadd.bf16 %v1630_v22, %v1594_v34 }
 0x1a1   : > { %v1643_v28 = vadd.bf16 %v1631_v10, %v1595_v39  ;;  %2408 = vtanh.bf16 %v1653_v11 }
 0x1a2   : > { %v1654_v47 = vmul.bf16 1061961548, %v1642_v7 }
 0x1a3   : > { %v1655_v37 = vmul.bf16 1061961548, %v1643_v28 }
 0x1a4   : > { %2410 = vtanh.bf16 %v1654_v47 }
 0x1a5   : > { %2412 = vtanh.bf16 %v1655_v37 }
 0x1ac   : > { %v2409_v60 = vpop.eup %2408 }
 0x1ad   : > { %v1677_v26 = vadd.bf16 1065369472, %v2409_v60 }
 0x1af   : > { %v2411_v19 = vpop.eup %2410  ;;  %v1689_v13 = vmul.bf16 1056980736, %v1677_v26 }
 0x1b0   : > { %v2413_v38 = vpop.eup %2412  ;;  %v1678_v36 = vadd.bf16 1065369472, %v2411_v19 }
 0x1b1   : > { %v1679_v44 = vadd.bf16 1065369472, %v2413_v38  ;;  %v1701_v31 = vmul.bf16 %v1689_v13, %v1593_v45 }
 0x1b2   : > { %v1690_v0 = vmul.bf16 1056980736, %v1678_v36 }
 0x1b3   : > { %v1691_v16 = vmul.bf16 1056980736, %v1679_v44  ;;  %v1773_v14 = vshrl.u32 %v1701_v31, 16 }
 0x1b4   : > { %v1702_v42 = vmul.bf16 %v1690_v0, %v1594_v34 }
 0x1b5   : > { %v1703_v52 = vmul.bf16 %v1691_v16, %v1595_v39  ;;  %v2186_v55 = vrot.slane %v1773_v14, 11 }
 0x1b6   : > { %v1778_v23 = vshrl.u32 %v1702_v42, 16  ;;  %v1781_v29 = vshll.u32 %v1702_v42, 16 }
 0x1b7   : > { %v1787_v33 = vshrl.u32 %v1703_v52, 16  ;;  %v1790_v57 = vshll.u32 %v1703_v52, 16 }
 0x1b8   : > { %v1780_v40 = vrot.slane %v1778_v23, 7 }
 0x1b9   : > { %v1789_v30 = vrot.slane %v1787_v33, 7 }
 0x1ba   : > { %v1783_v56 = vor.u32 %v1781_v29, %v1780_v40  ;;  %v1785_v63 = vrot.slane %v1780_v40, 4 }
 0x1bb   : > { %v1792_v3 = vor.u32 %v1790_v57, %v1789_v30 }
 0x1bc   : > { %v1784_v17 = vsel %vm3169_vm5, %v2186_v55, %v1783_v56 }
 0x1bd   : > { %v1793_v32 = vsel %vm3169_vm5, %v1785_v63, %v1792_v3 }
 0x1be   : > { %v2195_v18 = vcombine.high %v1784_v17, %v1793_v32  ;;  %v2194_v35 = vcombine.low %v1784_v17, %v1793_v32 }
 0x1c0   : > { %2017 = vmatprep.mubr.bf16.mxu1 %v2195_v18 }
 0x1c1   : > { %2018 = vmatmul.mubr.bf16.gmra.mrb[16].mxu1 %v2194_v35 }
 0x22a   : > { %v2247_v41 = vpop.f32.mrb[4].mxu1 }
 0x22b   : > { %v2248_v49 = vpop.f32.mrb[5].mxu1 }
 0x22c   : > { %v2249_v58 = vadd.f32 %v2248_v49, %v2247_v41  ;;  %v2250_v53 = vpop.f32.mrb[6].mxu1 }
 0x22d   : > { %v2251_v4 = vpop.f32.mrb[7].mxu1 }
 0x22e   : > { %v1996_v27 = vadd.f32 %v2249_v58, %v2187_v61  ;;  %v2252_v45 = vadd.f32 %v2251_v4, %v2250_v53 }
 0x230   : > { %2026 = vst [vmem:[%s3371_s23] sm:$0xff] %v1996_v27  ;;  %v1999_v62 = vadd.f32 %v2252_v45, %v2187_v61 }
 0x232   : > { %2027 = vst [vmem:[%s3371_s23 + $0x8] sm:$0xff] %v1999_v62 }
 0x24c   : > { %v2253_v59 = vpop.f32.mrb[8].mxu1 }
 0x24d   : > { %v2254_v25 = vpop.f32.mrb[9].mxu1 }
 0x24e   : > { %v2255_v6 = vadd.f32 %v2254_v25, %v2253_v59  ;;  %v2256_v21 = vpop.f32.mrb[10].mxu1 }
 0x24f   : > { %v2257_v15 = vpop.f32.mrb[11].mxu1 }
 0x250   : > { %v2004_v51 = vadd.f32 %v2255_v6, %v2187_v61  ;;  %v2258_v12 = vadd.f32 %v2257_v15, %v2256_v21 }
 0x252   : > { %2028 = vst [vmem:[%s3371_s23 + $0x10] sm:$0xff] %v2004_v51  ;;  %v2007_v20 = vadd.f32 %v2258_v12, %v2187_v61 }
 0x254   : > { %2029 = vst [vmem:[%s3371_s23 + $0x18] sm:$0xff] %v2007_v20 }
 0x270   : > { %v2259_v54 = vpop.f32.mrb[12].mxu1 }
 0x271   : > { %v2260_v34 = vpop.f32.mrb[13].mxu1 }
 0x272   : > { %v2261_v8 = vadd.f32 %v2260_v34, %v2259_v54  ;;  %v2262_v39 = vpop.f32.mrb[14].mxu1 }
 0x273   : > { %v2263_v43 = vpop.f32.mrb[15].mxu1 }
 0x274   : > { %v2012_v50 = vadd.f32 %v2261_v8, %v2187_v61  ;;  %v2264_v46 = vadd.f32 %v2263_v43, %v2262_v39 }
 0x276   : > { %2030 = vst [vmem:[%s3371_s23 + $0x20] sm:$0xff] %v2012_v50  ;;  %v2015_v1 = vadd.f32 %v2264_v46, %v2187_v61 }
 0x278   : > { %2031 = vst [vmem:[%s3371_s23 + $0x28] sm:$0xff] %v2015_v1 }
 0x294   : > { %v2265_v9 = vpop.f32.mrb[16].mxu1 }
 0x295   : > { %v2266_v2 = vpop.f32.mrb[17].mxu1 }
 0x296   : > { %v2267_v5 = vadd.f32 %v2266_v2, %v2265_v9  ;;  %v2268_v48 = vpop.f32.mrb[18].mxu1 }
 0x297   : > { %v2269_v24 = vpop.f32.mrb[19].mxu1 }
 0x298   : > { %v2020_v22 = vadd.f32 %v2267_v5, %v2187_v61  ;;  %v2270_v10 = vadd.f32 %v2269_v24, %v2268_v48 }
 0x29a   : > { %2032 = vst [vmem:[%s3371_s23 + $0x30] sm:$0xff] %v2020_v22  ;;  %v2023_v11 = vadd.f32 %v2270_v10, %v2187_v61 }
 0x29c   : > { %2033 = vst [vmem:[%s3371_s23 + $0x38] sm:$0xff] %v2023_v11 }
 0x29d   : > { %2428 = shalt.err (!%p2425_p11)
}
 0x29e   : > { %s2429_s18 = scalar_lea.hbm %s3385_s22, 1024  ;;  %s2433_s21 = scalar_lea.hbm %s3452_s7, 8192 }
 0x29f   : > { %p2430_p12 = scmp.ne.s32.totalorder %s3385_s22, %s2429_s18  ;;  %p2434_p1 = scmp.lt.u32.totalorder %s3385_s22, %s3452_s7 }
 0x2a0   : > { %p2435_p2 = scmp.lt.u32.totalorder %s2433_s21, %s2429_s18  ;;  %p2437_p5 = scmp.lt.u32.totalorder %s2429_s18, %s3385_s22 }
 0x2a1   : > { %p2431_p13 = pnand %p2430_p12, %p2607_p3 }
 0x2a2   : > { %p2436_p4 = por %p2435_p2, %p2434_p1 }
 0x2a3   : > { %p2432_p0 = pneg %p2431_p13 }
 0x2a4   : > { %p2438_p6 = por %p2437_p5, %p2436_p4 }
 0x2a6   : > { %p2439_p7 = pnand %p2438_p6, %p2432_p0 }
 0x2a8   : > { %2442 = shalt.err (!%p2439_p7)
}
 0x2a9   : > { %s2514_s17 = smov 128   ;;  %s2515_s28 = smov 8  }
 0x2aa   : > { %2271 = dma.vmem_to_hbm [thread:$0]  (%p2607_p3), %s3387_s10, 1024, %s3385_s22, %s3393_s27, %s2514_s17, %s2514_s17, %s2515_s28  }
 0x2ab PF: > { %p2277_p9 = scmp.ge.s32.totalorder %s2509_s8, 2  ;;  %s2065_s13 = sand.u32 1, %s2481_s24  }
 0x2ac   : > { %s2066_s11 = scalar_lea.sflag [#allocation4], %s2065_s13 }
 0x2ad   : > { %p2274_p10 = pnand %p2277_p9, %p2616_p8 }
 0x2af   : > { %2476 = dma.done.wait (!%p2274_p10), %s2066_s11, 1024  }
 0x2b0   : > { %2478 = vsyncadd (!%p2274_p10), %s2066_s11, 4294966272  ;;  %s20_s8 = sadd.s32 1, %s2509_s8   ;;  %s3471_s14 = sld [smem:[#allocation6_spill]] }
 0x2b1   : > { %p17_p11 = scmp.ge.s32.totalorder %s20_s8, 10   ;;  %s3472_s10 = sld [smem:[#allocation7_spill]] }
 0x2b2   : > { %s3473_s24 = smov %s2485_s25  ;;  %s3474_s25 = smov %s2489_s26 }
 0x2b3   : > { %s3475_s26 = smov %s2625_s19  ;;  %s3476_s27 = smov %s2501_s29 }
 0x2b4   : > { %s3477_s28 = smov %s2505_s30  ;;  %19 = sbr.rel (!%p17_p11) target bundleno = 5 (0x5), region = 88 }
 0x2b6   : > { %s3478_s29 = smov %s3471_s14 }
 0x2b7   : > { %s3479_s30 = smov %s3472_s10 }
 0x2bb   :  { %2071 = vsyncpa [#allocation4], 1 }
 0x2bc   :  { %2073 = vsyncpa [#allocation4 + $0x1], 1 }

</bundles_post_ra>
